<compile_context>
chip_gen: v7x
topology: tpu7x:2x2x1
jax: 0.10.0
libtpu: 0.0.40
codegen_flags: <defaults>
</compile_context>

<pallas_src>
import jax
import jax.numpy as jnp
from jax.experimental import pallas as pl
from jax.experimental.pallas import tpu as pltpu

F32 = jnp.float32
BF16 = jnp.bfloat16
OUT_DTYPE = jnp.bfloat16      # sigmoid probabilities tolerate bf16; use F32 for parity tests
LN_EPS = 1e-5
BN_EPS = 1e-5
NUM_UNITS = 54
TIME_STEPS = 24
OUT_DIM = NUM_UNITS * TIME_STEPS      # 1296


def _round_up(x, m):
    return ((x + m - 1) // m) * m


def _cdiv(a, b):
    return (a + b - 1) // b


# ---------------------------------------------------------------------------
# in-kernel math helpers (traced inside the Pallas kernel body)
# ---------------------------------------------------------------------------
def _gelu(x):
    # tanh-form GELU: ~6 VALU ops + one EUP tanh per element.
    c = 0.7978845608028654  # sqrt(2/pi)
    return 0.5 * x * (1.0 + jnp.tanh(c * (x + 0.044715 * x * x * x)))


def _relu(x):
    return jnp.maximum(x, 0.0)


def _layernorm(x, g, b):
    # g, b shaped (1, C) for broadcast; statistics in f32
    mu = jnp.mean(x, axis=-1, keepdims=True)
    var = jnp.mean(jnp.square(x - mu), axis=-1, keepdims=True)
    return (x - mu) * jax.lax.rsqrt(var + LN_EPS) * g + b


# ---------------------------------------------------------------------------
# the kernel
# ---------------------------------------------------------------------------
def tcn_classifier_kernel(
    graph_ref, load_ref,                  # activations: [Bt, src+dst], [Bt, load]
    w_g, w_l,                             # graph_fusion / load_projection weights (bf16)
    w_j1g, w_j1l, w_j2,                   # joint_fusion (w_j1 split 128/64) (bf16)
    w_t1, w_t2, w_t3,                     # TCN blocks, time on lanes (bf16)
    w_poolfc,                             # mean-pool + fc folded: [512, 128] (bf16)
    w_sp,                                 # status_predictor weight [128, 1296] (bf16)
    spb_ref,                              # status_predictor bias [1, 1296] f32
    vec_ref,                              # [16, 512] f32 packed 1-D params
    out_ref,                              # [Bt, 1296] bf16
):
    def vrow(idx, n):
        # (1, n) broadcastable row slice of the packed parameter array
        return vec_ref[idx:idx + 1, :n]

    def bdot(x, w_ref):
        # MXU matmul: bf16 operands, f32 accumulation
        return jnp.dot(x.astype(BF16), w_ref[...], preferred_element_type=F32)

    graph_in = graph_ref[...]
    load = load_ref[...]

    # graph_fusion: Linear(src+dst -> 128), ReLU, LayerNorm
    g = bdot(graph_in, w_g) + vrow(0, 128)
    g = _layernorm(_relu(g), vrow(1, 128), vrow(2, 128))

    # load_projection: Linear(load -> 64), GELU, LayerNorm
    l = bdot(load, w_l) + vrow(3, 64)
    l = _layernorm(_gelu(l), vrow(4, 64), vrow(5, 64))

    # joint_fusion: Linear(192 -> 256) as two accumulating dots (no lane concat),
    # ReLU, Linear(256 -> 128), GELU
    h = _relu(bdot(g, w_j1g) + bdot(l, w_j1l) + vrow(6, 256))
    joint = _gelu(bdot(h, w_j2) + vrow(7, 128))                       # [Bt, 128]

    # --- TCN over joint.unsqueeze(-1): Conv1d k=2, pad=(k-1)*d, seq 1->2->4->8 ---
    # With L == dilation at every block, each output timestep reads exactly one
    # tap; time stays on the lane axis (64 channels per timestep).  Conv bias +
    # eval-mode BatchNorm are pre-folded into per-lane scale/shift rows.
    y1 = _gelu(bdot(joint, w_t1) * vrow(8, 128) + vrow(9, 128))       # [Bt, 128]  T=2
    y2 = _gelu(bdot(y1, w_t2) * vrow(10, 256) + vrow(11, 256))        # [Bt, 256]  T=4
    y3 = _gelu(bdot(y2, w_t3) * vrow(12, 512) + vrow(13, 512))        # [Bt, 512]  T=8

    # mean over the 8 timesteps + fc(64 -> 128) folded into one [512,128] weight
    tcn_out = bdot(y3, w_poolfc) + vrow(14, 128)                      # [Bt, 128]

    # status_predictor: Linear(128 -> 1296), Sigmoid — live lanes only
    enhanced = joint + tcn_out
    logits = bdot(enhanced, w_sp) + spb_ref[...]                      # [Bt, 1296]
    prob = pl.reciprocal(1.0 + jnp.exp(-logits), approx=True)
    out_ref[...] = prob.astype(out_ref.dtype)


# ---------------------------------------------------------------------------
# deterministic parameter construction + host-side folding/packing (glue)
# ---------------------------------------------------------------------------
def init_params(key, src_dim, dst_dim, load_dim):
    ks = iter(jax.random.split(key, 64))

    def lin(in_f, out_f):
        bound = in_f ** -0.5
        w = jax.random.uniform(next(ks), (in_f, out_f), F32, -bound, bound)
        b = jax.random.uniform(next(ks), (out_f,), F32, -bound, bound)
        return w, b

    def ln(c):
        g = 1.0 + 0.1 * jax.random.normal(next(ks), (c,), F32)
        b = 0.1 * jax.random.normal(next(ks), (c,), F32)
        return g, b

    def conv(in_c, out_c):
        bound = (in_c * 2) ** -0.5      # fan_in = in_channels * kernel_size
        w0 = jax.random.uniform(next(ks), (in_c, out_c), F32, -bound, bound)  # tap 0
        w1 = jax.random.uniform(next(ks), (in_c, out_c), F32, -bound, bound)  # tap 1
        b = jax.random.uniform(next(ks), (out_c,), F32, -bound, bound)
        return w0, w1, b

    def bn(c):
        g = 1.0 + 0.1 * jax.random.normal(next(ks), (c,), F32)
        b = 0.1 * jax.random.normal(next(ks), (c,), F32)
        m = 0.1 * jax.random.normal(next(ks), (c,), F32)
        v = jax.random.uniform(next(ks), (c,), F32, 0.5, 1.5)
        return g, b, m, v

    gf_w, gf_b = lin(src_dim + dst_dim, 128)
    gf_lg, gf_lb = ln(128)
    lp_w, lp_b = lin(load_dim, 64)
    lp_lg, lp_lb = ln(64)
    jf_w1, jf_b1 = lin(128 + 64, 256)
    jf_w2, jf_b2 = lin(256, 128)
    convs = [conv(128, 64), conv(64, 64), conv(64, 64)]
    bns = [bn(64), bn(64), bn(64)]
    fc_w, fc_b = lin(64, 128)
    sp_w, sp_b = lin(128, OUT_DIM)

    # fold conv bias + eval-mode BatchNorm into per-channel scale/shift
    def fold_bn(cv, bnp):
        _, _, bias = cv
        g, beta, mean, var = bnp
        scale = g / jnp.sqrt(var + BN_EPS)
        shift = (bias - mean) * scale + beta
        return scale, shift

    s1, h1 = fold_bn(convs[0], bns[0])
    s2, h2 = fold_bn(convs[1], bns[1])
    s3, h3 = fold_bn(convs[2], bns[2])

    # Block 1 (T 1->2): lanes [tap1 -> t=0 | tap0 -> t=1]
    w_t1 = jnp.concatenate([convs[0][1], convs[0][0]], axis=1)             # [128, 128]
    # Block 2 (T 2->4): block-diagonal per input timestep, taps side-by-side
    eye2 = jnp.eye(2, dtype=F32)
    w_t2 = jnp.concatenate([jnp.kron(eye2, convs[1][1]),
                            jnp.kron(eye2, convs[1][0])], axis=1)          # [128, 256]
    # Block 3 (T 4->8)
    eye4 = jnp.eye(4, dtype=F32)
    w_t3 = jnp.concatenate([jnp.kron(eye4, convs[2][1]),
                            jnp.kron(eye4, convs[2][0])], axis=1)          # [256, 512]
    # mean over the 8 timesteps + fc folded into one weight
    w_poolfc = jnp.tile(fc_w, (8, 1)) / 8.0                                # [512, 128]

    # joint_fusion first linear split so the kernel never lane-concats g & l
    w_j1g, w_j1l = jf_w1[:128], jf_w1[128:]

    # pack all small 1-D params into one [16, 512] f32 array
    vec = jnp.zeros((16, 512), F32)
    rows = [gf_b, gf_lg, gf_lb, lp_b, lp_lg, lp_lb, jf_b1, jf_b2,
            jnp.tile(s1, 2), jnp.tile(h1, 2),
            jnp.tile(s2, 4), jnp.tile(h2, 4),
            jnp.tile(s3, 8), jnp.tile(h3, 8),
            fc_b]
    for i, v in enumerate(rows):
        vec = vec.at[i, :v.shape[0]].set(v)

    sp_bias = sp_b.reshape(1, OUT_DIM)

    return (gf_w.astype(BF16), lp_w.astype(BF16),
            w_j1g.astype(BF16), w_j1l.astype(BF16), jf_w2.astype(BF16),
            w_t1.astype(BF16), w_t2.astype(BF16), w_t3.astype(BF16),
            w_poolfc.astype(BF16), sp_w.astype(BF16),
            sp_bias, vec)


# ---------------------------------------------------------------------------
# wrapper
# ---------------------------------------------------------------------------
def _pick_batch_tile(b, cap=512):
    """Batch tile: multiple of 8, <= cap, and >=2 grid steps when b >= 16
    (so v7x's two TensorCores both get work under dimension_semantics=parallel)."""
    b8 = _round_up(b, 8)
    if b < 16:
        return b8
    n_steps = max(2, _cdiv(b8, cap))
    return _round_up(_cdiv(b8, n_steps), 8)


@jax.jit
def tcn_classifier_forward(src_emb, dst_emb, load_features, params):
    b = src_emb.shape[0]
    graph_in = jnp.concatenate([src_emb, dst_emb], axis=1).astype(F32)
    load = load_features.astype(F32)

    bt = _pick_batch_tile(b)
    b_pad = _round_up(b, bt)
    if b_pad != b:
        graph_in = jnp.pad(graph_in, ((0, b_pad - b), (0, 0)))
        load = jnp.pad(load, ((0, b_pad - b), (0, 0)))
    grid = (b_pad // bt,)

    # every weight/param stays VMEM-resident across grid steps (constant index_map)
    weight_specs = [pl.BlockSpec(w.shape, lambda i: (0, 0)) for w in params]

    out = pl.pallas_call(
        tcn_classifier_kernel,
        out_shape=jax.ShapeDtypeStruct((b_pad, OUT_DIM), OUT_DTYPE),
        grid=grid,
        in_specs=[
            pl.BlockSpec((bt, graph_in.shape[1]), lambda i: (i, 0)),
            pl.BlockSpec((bt, load.shape[1]), lambda i: (i, 0)),
            *weight_specs,
        ],
        out_specs=pl.BlockSpec((bt, OUT_DIM), lambda i: (i, 0)),
        compiler_params=pltpu.CompilerParams(
            dimension_semantics=("parallel",),
            vmem_limit_bytes=48 * 1024 * 1024,
        ),
    )(graph_in, load, *params)

    # (b_pad, 1296) -> (b, 54, 24): free bitcast when b == b_pad, tiny row-slice otherwise
    return out[:b].reshape(b, NUM_UNITS, TIME_STEPS)


if __name__ == "__main__":
    B, SRC_DIM, DST_DIM, LOAD_DIM = 2, 16, 16, 8
    key = jax.random.PRNGKey(0)
    k_src, k_dst, k_load, k_par = jax.random.split(key, 4)
    src_emb = jax.random.normal(k_src, (B, SRC_DIM), F32)
    dst_emb = jax.random.normal(k_dst, (B, DST_DIM), F32)
    load_features = jax.random.normal(k_load, (B, LOAD_DIM), F32)
    params = init_params(k_par, SRC_DIM, DST_DIM, LOAD_DIM)

    out = tcn_classifier_forward(src_emb, dst_emb, load_features, params)
    out = jax.block_until_ready(out)
    assert out.shape == (B, NUM_UNITS, TIME_STEPS)
    assert bool(jnp.all(jnp.isfinite(out)))
    assert bool(jnp.all((out >= 0) & (out <= 1)))
    print("KERNEL_OK")
</pallas_src>

<mosaic_0001>
module attributes {stable_mosaic.version = 11 : i64} {
  func.func @tcn_classifier_kernel(%arg0: i32, %arg1: memref<8x32xf32, #tpu.memory_space<vmem>>, %arg2: memref<8x8xf32, #tpu.memory_space<vmem>>, %arg3: memref<32x128xbf16, #tpu.memory_space<vmem>>, %arg4: memref<8x64xbf16, #tpu.memory_space<vmem>>, %arg5: memref<128x256xbf16, #tpu.memory_space<vmem>>, %arg6: memref<64x256xbf16, #tpu.memory_space<vmem>>, %arg7: memref<256x128xbf16, #tpu.memory_space<vmem>>, %arg8: memref<128x128xbf16, #tpu.memory_space<vmem>>, %arg9: memref<128x256xbf16, #tpu.memory_space<vmem>>, %arg10: memref<256x512xbf16, #tpu.memory_space<vmem>>, %arg11: memref<512x128xbf16, #tpu.memory_space<vmem>>, %arg12: memref<128x1296xbf16, #tpu.memory_space<vmem>>, %arg13: memref<1x1296xf32, #tpu.memory_space<vmem>>, %arg14: memref<16x512xf32, #tpu.memory_space<vmem>>, %arg15: memref<8x1296xbf16, #tpu.memory_space<vmem>>) attributes {dimension_semantics = [#tpu.dimension_semantics<parallel>], iteration_bounds = array<i64: 1>, scalar_prefetch = 0 : i64, scratch_operands = 0 : i64, tpu.core_type = #tpu.core_type<tc>, window_params = [{transform_indices = @transform_0, window_bounds = array<i64: 8, 32>}, {transform_indices = @transform_1, window_bounds = array<i64: 8, 8>}, {pipeline_mode = #tpu.pipeline_mode<synchronous>, transform_indices = @transform_2, window_bounds = array<i64: 32, 128>}, {pipeline_mode = #tpu.pipeline_mode<synchronous>, transform_indices = @transform_3, window_bounds = array<i64: 8, 64>}, {pipeline_mode = #tpu.pipeline_mode<synchronous>, transform_indices = @transform_4, window_bounds = array<i64: 128, 256>}, {pipeline_mode = #tpu.pipeline_mode<synchronous>, transform_indices = @transform_5, window_bounds = array<i64: 64, 256>}, {pipeline_mode = #tpu.pipeline_mode<synchronous>, transform_indices = @transform_6, window_bounds = array<i64: 256, 128>}, {pipeline_mode = #tpu.pipeline_mode<synchronous>, transform_indices = @transform_7, window_bounds = array<i64: 128, 128>}, {pipeline_mode = #tpu.pipeline_mode<synchronous>, transform_indices = @transform_8, window_bounds = array<i64: 128, 256>}, {pipeline_mode = #tpu.pipeline_mode<synchronous>, transform_indices = @transform_9, window_bounds = array<i64: 256, 512>}, {pipeline_mode = #tpu.pipeline_mode<synchronous>, transform_indices = @transform_10, window_bounds = array<i64: 512, 128>}, {pipeline_mode = #tpu.pipeline_mode<synchronous>, transform_indices = @transform_11, window_bounds = array<i64: 128, 1296>}, {pipeline_mode = #tpu.pipeline_mode<synchronous>, transform_indices = @transform_12, window_bounds = array<i64: 1, 1296>}, {pipeline_mode = #tpu.pipeline_mode<synchronous>, transform_indices = @transform_13, window_bounds = array<i64: 16, 512>}, {transform_indices = @transform_14, window_bounds = array<i64: 8, 1296>}]} {
    %c0 = arith.constant 0 : index
    %c0_0 = arith.constant 0 : index
    %0 = vector.load %arg1[%c0, %c0_0] : memref<8x32xf32, #tpu.memory_space<vmem>>, vector<8x32xf32>
    %c0_1 = arith.constant 0 : index
    %c0_2 = arith.constant 0 : index
    %1 = vector.load %arg2[%c0_1, %c0_2] : memref<8x8xf32, #tpu.memory_space<vmem>>, vector<8x8xf32>
    %2 = arith.truncf %0 : vector<8x32xf32> to vector<8x32xbf16>
    %c0_3 = arith.constant 0 : index
    %c0_4 = arith.constant 0 : index
    %3 = vector.load %arg3[%c0_3, %c0_4] : memref<32x128xbf16, #tpu.memory_space<vmem>>, vector<32x128xbf16>
    %cst = arith.constant dense<0.000000e+00> : vector<8x128xf32>
    %4 = tpu.matmul %2, %3, %cst {dimension_numbers = #tpu.dot_dimension_numbers<[1], [0], [0], [1], [0, 0, 1, 1], [], []>} : vector<8x32xbf16>, vector<32x128xbf16>, vector<8x128xf32> -> vector<8x128xf32>
    %c0_5 = arith.constant 0 : index
    %c0_6 = arith.constant 0 : index
    %5 = vector.load %arg14[%c0_5, %c0_6] : memref<16x512xf32, #tpu.memory_space<vmem>>, vector<1x128xf32>
    %6 = vector.broadcast %5 : vector<1x128xf32> to vector<8x128xf32>
    %7 = arith.addf %4, %6 : vector<8x128xf32>
    %cst_7 = arith.constant 0.000000e+00 : f32
    %8 = vector.broadcast %cst_7 : f32 to vector<8x128xf32>
    %9 = arith.maximumf %7, %8 : vector<8x128xf32>
    %c1 = arith.constant 1 : index
    %c0_8 = arith.constant 0 : index
    %10 = vector.load %arg14[%c1, %c0_8] : memref<16x512xf32, #tpu.memory_space<vmem>>, vector<1x128xf32>
    %c2 = arith.constant 2 : index
    %c0_9 = arith.constant 0 : index
    %11 = vector.load %arg14[%c2, %c0_9] : memref<16x512xf32, #tpu.memory_space<vmem>>, vector<1x128xf32>
    %cst_10 = arith.constant dense<0.000000e+00> : vector<8xf32>
    %12 = vector.multi_reduction <add>, %9, %cst_10 [1] : vector<8x128xf32> to vector<8xf32>
    %13 = vector.shape_cast %12 : vector<8xf32> to vector<8x1xf32>
    %cst_11 = arith.constant 1.280000e+02 : f32
    %14 = vector.broadcast %cst_11 : f32 to vector<8x1xf32>
    %15 = arith.divf %13, %14 : vector<8x1xf32>
    %16 = vector.broadcast %15 : vector<8x1xf32> to vector<8x128xf32>
    %17 = arith.subf %9, %16 : vector<8x128xf32>
    %18 = arith.mulf %17, %17 : vector<8x128xf32>
    %cst_12 = arith.constant dense<0.000000e+00> : vector<8xf32>
    %19 = vector.multi_reduction <add>, %18, %cst_12 [1] : vector<8x128xf32> to vector<8xf32>
    %20 = vector.shape_cast %19 : vector<8xf32> to vector<8x1xf32>
    %cst_13 = arith.constant 1.280000e+02 : f32
    %21 = vector.broadcast %cst_13 : f32 to vector<8x1xf32>
    %22 = arith.divf %20, %21 : vector<8x1xf32>
    %23 = vector.broadcast %15 : vector<8x1xf32> to vector<8x128xf32>
    %24 = arith.subf %9, %23 : vector<8x128xf32>
    %cst_14 = arith.constant 9.99999974E-6 : f32
    %25 = vector.broadcast %cst_14 : f32 to vector<8x1xf32>
    %26 = arith.addf %22, %25 : vector<8x1xf32>
    %27 = math.rsqrt %26 : vector<8x1xf32>
    %28 = vector.broadcast %27 : vector<8x1xf32> to vector<8x128xf32>
    %29 = arith.mulf %24, %28 : vector<8x128xf32>
    %30 = vector.broadcast %10 : vector<1x128xf32> to vector<8x128xf32>
    %31 = arith.mulf %29, %30 : vector<8x128xf32>
    %32 = vector.broadcast %11 : vector<1x128xf32> to vector<8x128xf32>
    %33 = arith.addf %31, %32 : vector<8x128xf32>
    %34 = arith.truncf %1 : vector<8x8xf32> to vector<8x8xbf16>
    %c0_15 = arith.constant 0 : index
    %c0_16 = arith.constant 0 : index
    %35 = vector.load %arg4[%c0_15, %c0_16] : memref<8x64xbf16, #tpu.memory_space<vmem>>, vector<8x64xbf16>
    %cst_17 = arith.constant dense<0.000000e+00> : vector<8x64xf32>
    %36 = tpu.matmul %34, %35, %cst_17 {dimension_numbers = #tpu.dot_dimension_numbers<[1], [0], [0], [1], [0, 0, 1, 1], [], []>} : vector<8x8xbf16>, vector<8x64xbf16>, vector<8x64xf32> -> vector<8x64xf32>
    %c3 = arith.constant 3 : index
    %c0_18 = arith.constant 0 : index
    %37 = vector.load %arg14[%c3, %c0_18] : memref<16x512xf32, #tpu.memory_space<vmem>>, vector<1x64xf32>
    %38 = vector.broadcast %37 : vector<1x64xf32> to vector<8x64xf32>
    %39 = arith.addf %36, %38 : vector<8x64xf32>
    %cst_19 = arith.constant 5.000000e-01 : f32
    %40 = vector.broadcast %cst_19 : f32 to vector<8x64xf32>
    %41 = arith.mulf %40, %39 : vector<8x64xf32>
    %cst_20 = arith.constant 4.471500e-02 : f32
    %42 = vector.broadcast %cst_20 : f32 to vector<8x64xf32>
    %43 = arith.mulf %42, %39 : vector<8x64xf32>
    %44 = arith.mulf %43, %39 : vector<8x64xf32>
    %45 = arith.mulf %44, %39 : vector<8x64xf32>
    %46 = arith.addf %39, %45 : vector<8x64xf32>
    %cst_21 = arith.constant 0.797884583 : f32
    %47 = vector.broadcast %cst_21 : f32 to vector<8x64xf32>
    %48 = arith.mulf %47, %46 : vector<8x64xf32>
    %49 = math.tanh %48 : vector<8x64xf32>
    %cst_22 = arith.constant 1.000000e+00 : f32
    %50 = vector.broadcast %cst_22 : f32 to vector<8x64xf32>
    %51 = arith.addf %50, %49 : vector<8x64xf32>
    %52 = arith.mulf %41, %51 : vector<8x64xf32>
    %c4 = arith.constant 4 : index
    %c0_23 = arith.constant 0 : index
    %53 = vector.load %arg14[%c4, %c0_23] : memref<16x512xf32, #tpu.memory_space<vmem>>, vector<1x64xf32>
    %c5 = arith.constant 5 : index
    %c0_24 = arith.constant 0 : index
    %54 = vector.load %arg14[%c5, %c0_24] : memref<16x512xf32, #tpu.memory_space<vmem>>, vector<1x64xf32>
    %cst_25 = arith.constant dense<0.000000e+00> : vector<8xf32>
    %55 = vector.multi_reduction <add>, %52, %cst_25 [1] : vector<8x64xf32> to vector<8xf32>
    %56 = vector.shape_cast %55 : vector<8xf32> to vector<8x1xf32>
    %cst_26 = arith.constant 6.400000e+01 : f32
    %57 = vector.broadcast %cst_26 : f32 to vector<8x1xf32>
    %58 = arith.divf %56, %57 : vector<8x1xf32>
    %59 = vector.broadcast %58 : vector<8x1xf32> to vector<8x64xf32>
    %60 = arith.subf %52, %59 : vector<8x64xf32>
    %61 = arith.mulf %60, %60 : vector<8x64xf32>
    %cst_27 = arith.constant dense<0.000000e+00> : vector<8xf32>
    %62 = vector.multi_reduction <add>, %61, %cst_27 [1] : vector<8x64xf32> to vector<8xf32>
    %63 = vector.shape_cast %62 : vector<8xf32> to vector<8x1xf32>
    %cst_28 = arith.constant 6.400000e+01 : f32
    %64 = vector.broadcast %cst_28 : f32 to vector<8x1xf32>
    %65 = arith.divf %63, %64 : vector<8x1xf32>
    %66 = vector.broadcast %58 : vector<8x1xf32> to vector<8x64xf32>
    %67 = arith.subf %52, %66 : vector<8x64xf32>
    %cst_29 = arith.constant 9.99999974E-6 : f32
    %68 = vector.broadcast %cst_29 : f32 to vector<8x1xf32>
    %69 = arith.addf %65, %68 : vector<8x1xf32>
    %70 = math.rsqrt %69 : vector<8x1xf32>
    %71 = vector.broadcast %70 : vector<8x1xf32> to vector<8x64xf32>
    %72 = arith.mulf %67, %71 : vector<8x64xf32>
    %73 = vector.broadcast %53 : vector<1x64xf32> to vector<8x64xf32>
    %74 = arith.mulf %72, %73 : vector<8x64xf32>
    %75 = vector.broadcast %54 : vector<1x64xf32> to vector<8x64xf32>
    %76 = arith.addf %74, %75 : vector<8x64xf32>
    %77 = arith.truncf %33 : vector<8x128xf32> to vector<8x128xbf16>
    %c0_30 = arith.constant 0 : index
    %c0_31 = arith.constant 0 : index
    %78 = vector.load %arg5[%c0_30, %c0_31] : memref<128x256xbf16, #tpu.memory_space<vmem>>, vector<128x256xbf16>
    %cst_32 = arith.constant dense<0.000000e+00> : vector<8x256xf32>
    %79 = tpu.matmul %77, %78, %cst_32 {dimension_numbers = #tpu.dot_dimension_numbers<[1], [0], [0], [1], [0, 0, 1, 1], [], []>} : vector<8x128xbf16>, vector<128x256xbf16>, vector<8x256xf32> -> vector<8x256xf32>
    %80 = arith.truncf %76 : vector<8x64xf32> to vector<8x64xbf16>
    %c0_33 = arith.constant 0 : index
    %c0_34 = arith.constant 0 : index
    %81 = vector.load %arg6[%c0_33, %c0_34] : memref<64x256xbf16, #tpu.memory_space<vmem>>, vector<64x256xbf16>
    %cst_35 = arith.constant dense<0.000000e+00> : vector<8x256xf32>
    %82 = tpu.matmul %80, %81, %cst_35 {dimension_numbers = #tpu.dot_dimension_numbers<[1], [0], [0], [1], [0, 0, 1, 1], [], []>} : vector<8x64xbf16>, vector<64x256xbf16>, vector<8x256xf32> -> vector<8x256xf32>
    %83 = arith.addf %79, %82 : vector<8x256xf32>
    %c6 = arith.constant 6 : index
    %c0_36 = arith.constant 0 : index
    %84 = vector.load %arg14[%c6, %c0_36] : memref<16x512xf32, #tpu.memory_space<vmem>>, vector<1x256xf32>
    %85 = vector.broadcast %84 : vector<1x256xf32> to vector<8x256xf32>
    %86 = arith.addf %83, %85 : vector<8x256xf32>
    %cst_37 = arith.constant 0.000000e+00 : f32
    %87 = vector.broadcast %cst_37 : f32 to vector<8x256xf32>
    %88 = arith.maximumf %86, %87 : vector<8x256xf32>
    %89 = arith.truncf %88 : vector<8x256xf32> to vector<8x256xbf16>
    %c0_38 = arith.constant 0 : index
    %c0_39 = arith.constant 0 : index
    %90 = vector.load %arg7[%c0_38, %c0_39] : memref<256x128xbf16, #tpu.memory_space<vmem>>, vector<256x128xbf16>
    %cst_40 = arith.constant dense<0.000000e+00> : vector<8x128xf32>
    %91 = tpu.matmul %89, %90, %cst_40 {dimension_numbers = #tpu.dot_dimension_numbers<[1], [0], [0], [1], [0, 0, 1, 1], [], []>} : vector<8x256xbf16>, vector<256x128xbf16>, vector<8x128xf32> -> vector<8x128xf32>
    %c7 = arith.constant 7 : index
    %c0_41 = arith.constant 0 : index
    %92 = vector.load %arg14[%c7, %c0_41] : memref<16x512xf32, #tpu.memory_space<vmem>>, vector<1x128xf32>
    %93 = vector.broadcast %92 : vector<1x128xf32> to vector<8x128xf32>
    %94 = arith.addf %91, %93 : vector<8x128xf32>
    %cst_42 = arith.constant 5.000000e-01 : f32
    %95 = vector.broadcast %cst_42 : f32 to vector<8x128xf32>
    %96 = arith.mulf %95, %94 : vector<8x128xf32>
    %cst_43 = arith.constant 4.471500e-02 : f32
    %97 = vector.broadcast %cst_43 : f32 to vector<8x128xf32>
    %98 = arith.mulf %97, %94 : vector<8x128xf32>
    %99 = arith.mulf %98, %94 : vector<8x128xf32>
    %100 = arith.mulf %99, %94 : vector<8x128xf32>
    %101 = arith.addf %94, %100 : vector<8x128xf32>
    %cst_44 = arith.constant 0.797884583 : f32
    %102 = vector.broadcast %cst_44 : f32 to vector<8x128xf32>
    %103 = arith.mulf %102, %101 : vector<8x128xf32>
    %104 = math.tanh %103 : vector<8x128xf32>
    %cst_45 = arith.constant 1.000000e+00 : f32
    %105 = vector.broadcast %cst_45 : f32 to vector<8x128xf32>
    %106 = arith.addf %105, %104 : vector<8x128xf32>
    %107 = arith.mulf %96, %106 : vector<8x128xf32>
    %108 = arith.truncf %107 : vector<8x128xf32> to vector<8x128xbf16>
    %c0_46 = arith.constant 0 : index
    %c0_47 = arith.constant 0 : index
    %109 = vector.load %arg8[%c0_46, %c0_47] : memref<128x128xbf16, #tpu.memory_space<vmem>>, vector<128x128xbf16>
    %cst_48 = arith.constant dense<0.000000e+00> : vector<8x128xf32>
    %110 = tpu.matmul %108, %109, %cst_48 {dimension_numbers = #tpu.dot_dimension_numbers<[1], [0], [0], [1], [0, 0, 1, 1], [], []>} : vector<8x128xbf16>, vector<128x128xbf16>, vector<8x128xf32> -> vector<8x128xf32>
    %c8 = arith.constant 8 : index
    %c0_49 = arith.constant 0 : index
    %111 = vector.load %arg14[%c8, %c0_49] : memref<16x512xf32, #tpu.memory_space<vmem>>, vector<1x128xf32>
    %112 = vector.broadcast %111 : vector<1x128xf32> to vector<8x128xf32>
    %113 = arith.mulf %110, %112 : vector<8x128xf32>
    %c9 = arith.constant 9 : index
    %c0_50 = arith.constant 0 : index
    %114 = vector.load %arg14[%c9, %c0_50] : memref<16x512xf32, #tpu.memory_space<vmem>>, vector<1x128xf32>
    %115 = vector.broadcast %114 : vector<1x128xf32> to vector<8x128xf32>
    %116 = arith.addf %113, %115 : vector<8x128xf32>
    %cst_51 = arith.constant 5.000000e-01 : f32
    %117 = vector.broadcast %cst_51 : f32 to vector<8x128xf32>
    %118 = arith.mulf %117, %116 : vector<8x128xf32>
    %cst_52 = arith.constant 4.471500e-02 : f32
    %119 = vector.broadcast %cst_52 : f32 to vector<8x128xf32>
    %120 = arith.mulf %119, %116 : vector<8x128xf32>
    %121 = arith.mulf %120, %116 : vector<8x128xf32>
    %122 = arith.mulf %121, %116 : vector<8x128xf32>
    %123 = arith.addf %116, %122 : vector<8x128xf32>
    %cst_53 = arith.constant 0.797884583 : f32
    %124 = vector.broadcast %cst_53 : f32 to vector<8x128xf32>
    %125 = arith.mulf %124, %123 : vector<8x128xf32>
    %126 = math.tanh %125 : vector<8x128xf32>
    %cst_54 = arith.constant 1.000000e+00 : f32
    %127 = vector.broadcast %cst_54 : f32 to vector<8x128xf32>
    %128 = arith.addf %127, %126 : vector<8x128xf32>
    %129 = arith.mulf %118, %128 : vector<8x128xf32>
    %130 = arith.truncf %129 : vector<8x128xf32> to vector<8x128xbf16>
    %c0_55 = arith.constant 0 : index
    %c0_56 = arith.constant 0 : index
    %131 = vector.load %arg9[%c0_55, %c0_56] : memref<128x256xbf16, #tpu.memory_space<vmem>>, vector<128x256xbf16>
    %cst_57 = arith.constant dense<0.000000e+00> : vector<8x256xf32>
    %132 = tpu.matmul %130, %131, %cst_57 {dimension_numbers = #tpu.dot_dimension_numbers<[1], [0], [0], [1], [0, 0, 1, 1], [], []>} : vector<8x128xbf16>, vector<128x256xbf16>, vector<8x256xf32> -> vector<8x256xf32>
    %c10 = arith.constant 10 : index
    %c0_58 = arith.constant 0 : index
    %133 = vector.load %arg14[%c10, %c0_58] : memref<16x512xf32, #tpu.memory_space<vmem>>, vector<1x256xf32>
    %134 = vector.broadcast %133 : vector<1x256xf32> to vector<8x256xf32>
    %135 = arith.mulf %132, %134 : vector<8x256xf32>
    %c11 = arith.constant 11 : index
    %c0_59 = arith.constant 0 : index
    %136 = vector.load %arg14[%c11, %c0_59] : memref<16x512xf32, #tpu.memory_space<vmem>>, vector<1x256xf32>
    %137 = vector.broadcast %136 : vector<1x256xf32> to vector<8x256xf32>
    %138 = arith.addf %135, %137 : vector<8x256xf32>
    %cst_60 = arith.constant 5.000000e-01 : f32
    %139 = vector.broadcast %cst_60 : f32 to vector<8x256xf32>
    %140 = arith.mulf %139, %138 : vector<8x256xf32>
    %cst_61 = arith.constant 4.471500e-02 : f32
    %141 = vector.broadcast %cst_61 : f32 to vector<8x256xf32>
    %142 = arith.mulf %141, %138 : vector<8x256xf32>
    %143 = arith.mulf %142, %138 : vector<8x256xf32>
    %144 = arith.mulf %143, %138 : vector<8x256xf32>
    %145 = arith.addf %138, %144 : vector<8x256xf32>
    %cst_62 = arith.constant 0.797884583 : f32
    %146 = vector.broadcast %cst_62 : f32 to vector<8x256xf32>
    %147 = arith.mulf %146, %145 : vector<8x256xf32>
    %148 = math.tanh %147 : vector<8x256xf32>
    %cst_63 = arith.constant 1.000000e+00 : f32
    %149 = vector.broadcast %cst_63 : f32 to vector<8x256xf32>
    %150 = arith.addf %149, %148 : vector<8x256xf32>
    %151 = arith.mulf %140, %150 : vector<8x256xf32>
    %152 = arith.truncf %151 : vector<8x256xf32> to vector<8x256xbf16>
    %c0_64 = arith.constant 0 : index
    %c0_65 = arith.constant 0 : index
    %153 = vector.load %arg10[%c0_64, %c0_65] : memref<256x512xbf16, #tpu.memory_space<vmem>>, vector<256x512xbf16>
    %cst_66 = arith.constant dense<0.000000e+00> : vector<8x512xf32>
    %154 = tpu.matmul %152, %153, %cst_66 {dimension_numbers = #tpu.dot_dimension_numbers<[1], [0], [0], [1], [0, 0, 1, 1], [], []>} : vector<8x256xbf16>, vector<256x512xbf16>, vector<8x512xf32> -> vector<8x512xf32>
    %c12 = arith.constant 12 : index
    %c0_67 = arith.constant 0 : index
    %155 = vector.load %arg14[%c12, %c0_67] : memref<16x512xf32, #tpu.memory_space<vmem>>, vector<1x512xf32>
    %156 = vector.broadcast %155 : vector<1x512xf32> to vector<8x512xf32>
    %157 = arith.mulf %154, %156 : vector<8x512xf32>
    %c13 = arith.constant 13 : index
    %c0_68 = arith.constant 0 : index
    %158 = vector.load %arg14[%c13, %c0_68] : memref<16x512xf32, #tpu.memory_space<vmem>>, vector<1x512xf32>
    %159 = vector.broadcast %158 : vector<1x512xf32> to vector<8x512xf32>
    %160 = arith.addf %157, %159 : vector<8x512xf32>
    %cst_69 = arith.constant 5.000000e-01 : f32
    %161 = vector.broadcast %cst_69 : f32 to vector<8x512xf32>
    %162 = arith.mulf %161, %160 : vector<8x512xf32>
    %cst_70 = arith.constant 4.471500e-02 : f32
    %163 = vector.broadcast %cst_70 : f32 to vector<8x512xf32>
    %164 = arith.mulf %163, %160 : vector<8x512xf32>
    %165 = arith.mulf %164, %160 : vector<8x512xf32>
    %166 = arith.mulf %165, %160 : vector<8x512xf32>
    %167 = arith.addf %160, %166 : vector<8x512xf32>
    %cst_71 = arith.constant 0.797884583 : f32
    %168 = vector.broadcast %cst_71 : f32 to vector<8x512xf32>
    %169 = arith.mulf %168, %167 : vector<8x512xf32>
    %170 = math.tanh %169 : vector<8x512xf32>
    %cst_72 = arith.constant 1.000000e+00 : f32
    %171 = vector.broadcast %cst_72 : f32 to vector<8x512xf32>
    %172 = arith.addf %171, %170 : vector<8x512xf32>
    %173 = arith.mulf %162, %172 : vector<8x512xf32>
    %174 = arith.truncf %173 : vector<8x512xf32> to vector<8x512xbf16>
    %c0_73 = arith.constant 0 : index
    %c0_74 = arith.constant 0 : index
    %175 = vector.load %arg11[%c0_73, %c0_74] : memref<512x128xbf16, #tpu.memory_space<vmem>>, vector<512x128xbf16>
    %cst_75 = arith.constant dense<0.000000e+00> : vector<8x128xf32>
    %176 = tpu.matmul %174, %175, %cst_75 {dimension_numbers = #tpu.dot_dimension_numbers<[1], [0], [0], [1], [0, 0, 1, 1], [], []>} : vector<8x512xbf16>, vector<512x128xbf16>, vector<8x128xf32> -> vector<8x128xf32>
    %c14 = arith.constant 14 : index
    %c0_76 = arith.constant 0 : index
    %177 = vector.load %arg14[%c14, %c0_76] : memref<16x512xf32, #tpu.memory_space<vmem>>, vector<1x128xf32>
    %178 = vector.broadcast %177 : vector<1x128xf32> to vector<8x128xf32>
    %179 = arith.addf %176, %178 : vector<8x128xf32>
    %180 = arith.addf %107, %179 : vector<8x128xf32>
    %181 = arith.truncf %180 : vector<8x128xf32> to vector<8x128xbf16>
    %c0_77 = arith.constant 0 : index
    %c0_78 = arith.constant 0 : index
    %182 = vector.load %arg12[%c0_77, %c0_78] : memref<128x1296xbf16, #tpu.memory_space<vmem>>, vector<128x1296xbf16>
    %cst_79 = arith.constant dense<0.000000e+00> : vector<8x1296xf32>
    %183 = tpu.matmul %181, %182, %cst_79 {dimension_numbers = #tpu.dot_dimension_numbers<[1], [0], [0], [1], [0, 0, 1, 1], [], []>} : vector<8x128xbf16>, vector<128x1296xbf16>, vector<8x1296xf32> -> vector<8x1296xf32>
    %c0_80 = arith.constant 0 : index
    %c0_81 = arith.constant 0 : index
    %184 = vector.load %arg13[%c0_80, %c0_81] : memref<1x1296xf32, #tpu.memory_space<vmem>>, vector<1x1296xf32>
    %185 = vector.broadcast %184 : vector<1x1296xf32> to vector<8x1296xf32>
    %186 = arith.addf %183, %185 : vector<8x1296xf32>
    %cst_82 = arith.constant 0.000000e+00 : f32
    %187 = vector.broadcast %cst_82 : f32 to vector<8x1296xf32>
    %188 = arith.subf %187, %186 : vector<8x1296xf32>
    %189 = math.exp %188 : vector<8x1296xf32>
    %cst_83 = arith.constant 1.000000e+00 : f32
    %190 = vector.broadcast %cst_83 : f32 to vector<8x1296xf32>
    %191 = arith.addf %190, %189 : vector<8x1296xf32>
    %192 = tpu.reciprocal %191 {approx = true} : vector<8x1296xf32> -> vector<8x1296xf32>
    %193 = arith.truncf %192 : vector<8x1296xf32> to vector<8x1296xbf16>
    %c0_84 = arith.constant 0 : index
    %c0_85 = arith.constant 0 : index
    %194 = vector.load %arg15[%c0_84, %c0_85] : memref<8x1296xbf16, #tpu.memory_space<vmem>>, vector<8x1296xbf16>
    tpu.vector_store %arg15[%c0_84, %c0_85], %193 {strides = array<i32>} : memref<8x1296xbf16, #tpu.memory_space<vmem>>, vector<8x1296xbf16>,
    return
  }
  func.func @transform_0(%arg0: i32) -> (i32, i32) {
    %c0_i32 = arith.constant 0 : i32
    %c0_i32_0 = arith.constant 0 : i32
    return %arg0, %c0_i32 : i32, i32
  }
  func.func @transform_1(%arg0: i32) -> (i32, i32) {
    %c0_i32 = arith.constant 0 : i32
    %c0_i32_0 = arith.constant 0 : i32
    return %arg0, %c0_i32 : i32, i32
  }
  func.func @transform_2(%arg0: i32) -> (i32, i32) {
    %c0_i32 = arith.constant 0 : i32
    %c0_i32_0 = arith.constant 0 : i32
    %c0_i32_1 = arith.constant 0 : i32
    return %c0_i32, %c0_i32_0 : i32, i32
  }
  func.func @transform_3(%arg0: i32) -> (i32, i32) {
    %c0_i32 = arith.constant 0 : i32
    %c0_i32_0 = arith.constant 0 : i32
    %c0_i32_1 = arith.constant 0 : i32
    return %c0_i32, %c0_i32_0 : i32, i32
  }
  func.func @transform_4(%arg0: i32) -> (i32, i32) {
    %c0_i32 = arith.constant 0 : i32
    %c0_i32_0 = arith.constant 0 : i32
    %c0_i32_1 = arith.constant 0 : i32
    return %c0_i32, %c0_i32_0 : i32, i32
  }
  func.func @transform_5(%arg0: i32) -> (i32, i32) {
    %c0_i32 = arith.constant 0 : i32
    %c0_i32_0 = arith.constant 0 : i32
    %c0_i32_1 = arith.constant 0 : i32
    return %c0_i32, %c0_i32_0 : i32, i32
  }
  func.func @transform_6(%arg0: i32) -> (i32, i32) {
    %c0_i32 = arith.constant 0 : i32
    %c0_i32_0 = arith.constant 0 : i32
    %c0_i32_1 = arith.constant 0 : i32
    return %c0_i32, %c0_i32_0 : i32, i32
  }
  func.func @transform_7(%arg0: i32) -> (i32, i32) {
    %c0_i32 = arith.constant 0 : i32
    %c0_i32_0 = arith.constant 0 : i32
    %c0_i32_1 = arith.constant 0 : i32
    return %c0_i32, %c0_i32_0 : i32, i32
  }
  func.func @transform_8(%arg0: i32) -> (i32, i32) {
    %c0_i32 = arith.constant 0 : i32
    %c0_i32_0 = arith.constant 0 : i32
    %c0_i32_1 = arith.constant 0 : i32
    return %c0_i32, %c0_i32_0 : i32, i32
  }
  func.func @transform_9(%arg0: i32) -> (i32, i32) {
    %c0_i32 = arith.constant 0 : i32
    %c0_i32_0 = arith.constant 0 : i32
    %c0_i32_1 = arith.constant 0 : i32
    return %c0_i32, %c0_i32_0 : i32, i32
  }
  func.func @transform_10(%arg0: i32) -> (i32, i32) {
    %c0_i32 = arith.constant 0 : i32
    %c0_i32_0 = arith.constant 0 : i32
    %c0_i32_1 = arith.constant 0 : i32
    return %c0_i32, %c0_i32_0 : i32, i32
  }
  func.func @transform_11(%arg0: i32) -> (i32, i32) {
    %c0_i32 = arith.constant 0 : i32
    %c0_i32_0 = arith.constant 0 : i32
    %c0_i32_1 = arith.constant 0 : i32
    return %c0_i32, %c0_i32_0 : i32, i32
  }
  func.func @transform_12(%arg0: i32) -> (i32, i32) {
    %c0_i32 = arith.constant 0 : i32
    %c0_i32_0 = arith.constant 0 : i32
    %c0_i32_1 = arith.constant 0 : i32
    return %c0_i32, %c0_i32_0 : i32, i32
  }
  func.func @transform_13(%arg0: i32) -> (i32, i32) {
    %c0_i32 = arith.constant 0 : i32
    %c0_i32_0 = arith.constant 0 : i32
    %c0_i32_1 = arith.constant 0 : i32
    return %c0_i32, %c0_i32_0 : i32, i32
  }
  func.func @transform_14(%arg0: i32) -> (i32, i32) {
    %c0_i32 = arith.constant 0 : i32
    %c0_i32_0 = arith.constant 0 : i32
    return %arg0, %c0_i32 : i32, i32
  }
}

</mosaic_0001>

<bundles_post_ra>
// kernel: tcn_classifier_forward.1
= control target key start
LH: loop header
LB: loop body
LE: loop exit
PB: predicated region body
PF: predicated region fallthrough
CT: control target
= control target key end

     0   :  { %v3624_v0 = vmov 0.0   ;;  %vm3625_vm0 = vmmov 0   ;;  %vm136_vm1 = vcmask 1043456   ;;  %vm68_vm2 = vcmask 261120   ;;  %s4625_s2 = inlined_call_operand.vmem [shape: bf16[32,128], index: 2, kind: input, shape index: {}]   ;;  %s4626_s0 = inlined_call_operand.vmem [shape: f32[8,32], index: 0, kind: input, shape index: {}]   ;;  %s4627_s3 = inlined_call_operand.vmem [shape: bf16[8,64], index: 3, kind: input, shape index: {}]   ;;  %s4628_s1 = inlined_call_operand.vmem [shape: f32[8,8], index: 1, kind: input, shape index: {}]   ;;  %s4629_s13 = inlined_call_operand.vmem [shape: f32[16,512], index: 13, kind: input, shape index: {}]   ;;  %s4630_s4 = inlined_call_operand.vmem [shape: bf16[128,256], index: 4, kind: input, shape index: {}]   ;;  %s4631_s5 = inlined_call_operand.vmem [shape: bf16[64,256], index: 5, kind: input, shape index: {}]   ;;  %s4632_s6 = inlined_call_operand.vmem [shape: bf16[256,128], index: 6, kind: input, shape index: {}]   ;;  %s4633_s7 = inlined_call_operand.vmem [shape: bf16[128,128], index: 7, kind: input, shape index: {}]   ;;  %s4634_s8 = inlined_call_operand.vmem [shape: bf16[128,256], index: 8, kind: input, shape index: {}]   ;;  %s4635_s9 = inlined_call_operand.vmem [shape: bf16[256,512], index: 9, kind: input, shape index: {}]   ;;  %s4636_s10 = inlined_call_operand.vmem [shape: bf16[512,128], index: 10, kind: input, shape index: {}]   ;;  %s4637_s11 = inlined_call_operand.vmem [shape: bf16[128,1296], index: 11, kind: input, shape index: {}]   ;;  %s4638_s12 = inlined_call_operand.vmem [shape: f32[1,1296], index: 12, kind: input, shape index: {}]   ;;  %s4639_s14 = inlined_call_operand.vmem [shape: bf16[8,1296], index: 14, kind: output, shape index: {}]  }
   0x1   :  { %3159 = vmatprep.subr.bf16.mxu0 %v3624_v0  ;;  %v3216_v1 = vld [vmem:[%s4625_s2] sm:$0xff]   ;;  %3163 = vmatprep.mubr.msk.bf16.mxu0 %vm3625_vm0, %v3624_v0  ;;  %v3217_v2 = vld [vmem:[%s4625_s2 + $0x8] sm:$0xff]   ;;  %vm132_vm3 = vcmask 64512   ;;  %vm191_vm4 = vcmask 523264   ;;  %v3223_v34 = vld [vmem:[%s4630_s4 + $0x14] ss:$8 sps:$4 sm:$0xff]  }
   0x2   :  { %3160 = vmatpush3.bf16.msra.mxu0 %v3216_v1  ;;  %v48_v3 = vld [vmem:[%s4626_s0] sm:$0xff]  ;;  %v3221_v35 = vld [vmem:[%s4630_s4 + $0x10] ss:$8 sps:$4 sm:$0xff]   ;;  %v3229_v47 = vld [vmem:[%s4630_s4 + $0x34] ss:$8 sps:$4 sm:$0xff]   ;;  %v3626_v1 = vmov 0  }
   0x3   :  { %3161 = vmatprep.subr.bf16.mxu0 %v3624_v0  ;;  %v130_v4 = vld [vmem:[%s4627_s3] sm:$0xf]  ;;  %v50_v5 = vpack.c.bf16 %v48_v3, %v48_v3  ;;  %v3220_v33 = vld [vmem:[%s4630_s4 + $0x4] ss:$8 sps:$4 sm:$0xff]   ;;  %v3227_v48 = vld [vmem:[%s4630_s4 + $0x30] ss:$8 sps:$4 sm:$0xff]   ;;  %309 = vmatprep.mubr.bf16.mxu1 %v3626_v1 }
   0x4   :  { %v138_v6 = vsel %vm136_vm1, %v130_v4, 0  ;;  %v49_v7 = vld [vmem:[%s4628_s1] sm:$0xff]  ;;  %v3235_v52 = vld [vmem:[%s4630_s4 + $0x50] ss:$8 sps:$4 sm:$0xff]   ;;  %v3237_v53 = vld [vmem:[%s4630_s4 + $0x54] ss:$8 sps:$4 sm:$0xff]  }
   0x5   :  { %v129_v8 = vpack.c.bf16 %v49_v7, %v49_v7  ;;  %v131_v13 = vld [vmem:[%s4629_s13 + $0x3] ss:$0 sm:$0xff]  ;;  %v55_v25 = vld [vmem:[%s4629_s13] ss:$0 sm:$0xff]  ;;  %v3226_v36 = vld [vmem:[%s4630_s4 + $0x24] ss:$8 sps:$4 sm:$0xff]  }
   0x6   :  { %3162 = vmatpush3.bf16.msra.mxu0 %v3217_v2  ;;  %v3218_v32 = vld [vmem:[%s4630_s4] ss:$8 sps:$4 sm:$0xff]   ;;  %v3232_v49 = vld [vmem:[%s4630_s4 + $0x44] ss:$8 sps:$4 sm:$0xff]   ;;  %v3239_v55 = vld [vmem:[%s4631_s5 + $0x14] ss:$8 sps:$4 sm:$0xff]  }
   0x7   :  { %3167 = vmatprep.subr.bf16.mxu0 %v3624_v0  ;;  %v3224_v37 = vld [vmem:[%s4630_s4 + $0x20] ss:$8 sps:$4 sm:$0xff]   ;;  %v3233_v51 = vld [vmem:[%s4631_s5 + $0x4] ss:$8 sps:$4 sm:$0xff]   ;;  %v3244_v58 = vld [vmem:[%s4631_s5 + $0x10] ss:$8 sps:$4 sm:$0xff]  }
   0x8   :  { %v3230_v50 = vld [vmem:[%s4630_s4 + $0x40] ss:$8 sps:$4 sm:$0xff]   ;;  %277 = vmatprep.subr.bf16.mxu1 %v3233_v51  ;;  %v3243_v56 = vld [vmem:[%s4630_s4 + $0x64] ss:$8 sps:$4 sm:$0xff]   ;;  %v3249_v60 = vld [vmem:[%s4630_s4 + $0x74] ss:$8 sps:$4 sm:$0xff]  }
   0x9   :  { %3164 = vmatmul.mubr.msk.bf16.vlgmr.msra.gmra.mrb[0].mxu0 %vm68_vm2, %v50_v5  ;;  %v3238_v54 = vld [vmem:[%s4631_s5] ss:$8 sps:$4 sm:$0xff]   ;;  %v3245_v59 = vld [vmem:[%s4631_s5 + $0x24] ss:$8 sps:$4 sm:$0xff]   ;;  %v3247_v61 = vld [vmem:[%s4630_s4 + $0x70] ss:$8 sps:$4 sm:$0xff]  }
   0xa   :  { %3168 = vmatpush3.bf16.msra.mxu0 %v138_v6  ;;  %3169 = vmatprep.mubr.msk.bf16.mxu0 %vm3625_vm0, %v3624_v0  ;;  %v3241_v57 = vld [vmem:[%s4630_s4 + $0x60] ss:$8 sps:$4 sm:$0xff]   ;;  %v3251_v63 = vld [vmem:[%s4631_s5 + $0x34] ss:$8 sps:$4 sm:$0xff]   ;;  %v3253_v2 = vld [vmem:[%s4631_s5 + $0x30] ss:$8 sps:$4 sm:$0xff]  }
   0xb   :  { %398 = vmatprep.subr.bf16.mxu0 %v3220_v33  ;;  %278 = vmatpush1.bf16.msra.mxu1 %v3238_v54  ;;  %v3250_v62 = vld [vmem:[%s4631_s5 + $0x20] ss:$8 sps:$4 sm:$0xff]   ;;  %vm2794_vm5 = vcmask 125952  }
   0xc   :  { %279 = vmatprep.subr.bf16.mxu1 %v3239_v55  ;;  %v3254_v3 = vld [vmem:[%s4632_s6 + $0x40] sm:$0xff]   ;;  %v3264_v33 = vld [vmem:[%s4632_s6 + $0x68] sm:$0xff]  }
   0xf   :  { %280 = vmatpush1.bf16.msra.mxu1 %v3244_v58 }
  0x10   :  { %281 = vmatprep.subr.bf16.mxu1 %v3245_v59 }
  0x11   :  { %3170 = vmatmul.mubr.msk.bf16.vlgmr.msra.gmra.mrb[4].mxu0 %vm132_vm3, %v129_v8 }
  0x12   :  { %399 = vmatpush1.bf16.msra.mxu0 %v3218_v32  ;;  %430 = vmatprep.mubr.bf16.mxu0 %v3626_v1  ;;  %v3263_v32 = vld [vmem:[%s4632_s6 + $0x20] sm:$0xff]  }
  0x13   :  { %400 = vmatprep.subr.bf16.mxu0 %v3223_v34  ;;  %282 = vmatpush1.bf16.msra.mxu1 %v3250_v62  ;;  %v3265_v34 = vld [vmem:[%s4632_s6 + $0x28] sm:$0xff]   ;;  %v3270_v62 = vld [vmem:[%s4633_s7] sm:$0xff]  }
  0x14   :  { %283 = vmatprep.subr.bf16.mxu1 %v3251_v63  ;;  %v3271_v63 = vld [vmem:[%s4633_s7 + $0x8] sm:$0xff]  }
  0x16   :  { %401 = vmatpush1.bf16.msra.mxu0 %v3221_v35  ;;  %v3266_v35 = vld [vmem:[%s4632_s6 + $0x70] sm:$0xff]  }
  0x17   :  { %402 = vmatprep.subr.bf16.mxu0 %v3226_v36  ;;  %284 = vmatpush1.bf16.msra.mxu1 %v3253_v2  ;;  %v3267_v36 = vld [vmem:[%s4632_s6 + $0x30] sm:$0xff]  }
  0x18   :  { %3075 = vmatprep.subr.bf16.mxu1 %v3254_v3  ;;  %v3272_v2 = vld [vmem:[%s4633_s7 + $0x10] sm:$0xff]   ;;  %v3273_v3 = vld [vmem:[%s4633_s7 + $0x18] sm:$0xff]  }
  0x1a   :  { %403 = vmatpush1.bf16.msra.mxu0 %v3224_v37  ;;  %v3268_v37 = vld [vmem:[%s4632_s6 + $0x78] sm:$0xff]  }
  0x1b   :  { %404 = vmatprep.subr.bf16.mxu0 %v3229_v47 }
  0x1e   :  { %405 = vmatpush1.bf16.msra.mxu0 %v3227_v48 }
  0x1f   :  { %406 = vmatprep.subr.bf16.mxu0 %v3232_v49 }
  0x22   :  { %407 = vmatpush1.bf16.msra.mxu0 %v3230_v50 }
  0x23   :  { %408 = vmatprep.subr.bf16.mxu0 %v3237_v53 }
  0x26   :  { %409 = vmatpush1.bf16.msra.mxu0 %v3235_v52 }
  0x27   :  { %410 = vmatprep.subr.bf16.mxu0 %v3243_v56 }
  0x2a   :  { %411 = vmatpush1.bf16.msra.mxu0 %v3241_v57 }
  0x2b   :  { %412 = vmatprep.subr.bf16.mxu0 %v3249_v60 }
  0x2e   :  { %413 = vmatpush1.bf16.msra.mxu0 %v3247_v61 }
  0x2f   :  { %3173 = vmatprep.subr.bf16.mxu0 %v3624_v0 }
  0xdc   :  { %v106_v9 = vpop.f32.mrb[0].mxu0 }
  0xdd   :  { %v3165_v10 = vpop.f32.mrb[1].mxu0  ;;  %v107_v29 = vadd.f32 %v106_v9, %v55_v25  ;;  %v3256_v25 = vld [vmem:[%s4632_s6 + $0x48] sm:$0xff]  }
  0xde   :  { %v109_v11 = vpop.f32.mrb[2].mxu0 }
  0xdf   :  { %v3166_v12 = vpop.f32.mrb[3].mxu0  ;;  %v112_v31 = vmax.f32 %v107_v29, 0.0  ;;  %v113_v11 = vld [vmem:[%s4629_s13 + $0x1] ss:$0 sm:$0xff]  ;;  %v3260_v29 = vld [vmem:[%s4632_s6 + $0x58] sm:$0xff]  }
  0xe4   :  { %v174_v14 = vpop.f32.mrb[4].mxu0 }
  0xe5   :  { %v175_v15 = vadd.f32 %v174_v14, %v131_v13  ;;  %v3171_v16 = vpop.f32.mrb[5].mxu0  ;;  %v114_v13 = vld [vmem:[%s4629_s13 + $0x2] ss:$0 sm:$0xff] }
  0xe6   :  { %v177_v17 = vpop.f32.mrb[6].mxu0  ;;  %v189_v16 = vld [vmem:[%s4629_s13 + $0x4] ss:$0 sm:$0xff] }
  0xe7   :  { %v181_v18 = vmul.f32 0.044715, %v175_v15  ;;  %v3172_v19 = vpop.f32.mrb[7].mxu0  ;;  %v180_v26 = vmul.f32 0.5, %v175_v15 }
  0xe8   :  { %v190_v19 = vld [vmem:[%s4629_s13 + $0x5] ss:$0 sm:$0xff] }
  0xe9   :  { %v182_v20 = vmul.f32 %v181_v18, %v175_v15 }
  0xeb   :  { %v183_v21 = vmul.f32 %v182_v20, %v175_v15 }
  0xed   :  { %v184_v22 = vadd.f32 %v183_v21, %v175_v15 }
  0xef   :  { %v185_v23 = vmul.f32 0.7978846, %v184_v22 }
  0xf1   :  { %3558 = vtanh.f32 %v185_v23  ;;  %v3255_v23 = vld [vmem:[%s4632_s6] sm:$0xff]  }
  0xfb   :  { %v3559_v24 = vpop.eup %3558 }
  0xfc   :  { %v187_v27 = vadd.f32 1.0, %v3559_v24 }
  0xfe   :  { %v188_v28 = vmul.f32 %v187_v27, %v180_v26  ;;  %v3257_v26 = vld [vmem:[%s4632_s6 + $0x8] sm:$0xff]   ;;  %v3258_v27 = vld [vmem:[%s4632_s6 + $0x50] sm:$0xff]  }
 0x100   :  { %v192_v30 = vsel %vm191_vm4, %v188_v28, 0.0 }
 0x101   :  { %193 = vadd.xlane.f32.xlu0 %v192_v30  ;;  %v3261_v30 = vld [vmem:[%s4632_s6 + $0x18] sm:$0xff]  }
 0x105   :  { %115 = vadd.xlane.f32.xlu0 %v112_v31 }
 0x18e   :  { %v194_v38 = vpop.xlane.xlu0 %193 }
 0x18f   :  { %v196_v39 = vmul.f32 0.015625, %v194_v38  ;;  %v3269_v38 = vld [vmem:[%s4632_s6 + $0x38] sm:$0xff]  }
 0x191   :  { %v3749_v42 = vsub.f32 %v188_v28, %v196_v39  ;;  %v3259_v28 = vld [vmem:[%s4632_s6 + $0x10] sm:$0xff]   ;;  %v442_v39 = vlaneseq }
 0x192   :  { %v116_v40 = vpop.xlane.xlu0 %115 }
 0x193   :  { %v118_v41 = vmul.f32 0.0078125, %v116_v40  ;;  %v198_v45 = vmul.f32 %v3749_v42, %v3749_v42  ;;  %v3875_v40 = vshrl.u32 %v442_v39, 7  ;;  %v3301_v39 = vld [vmem:[%s4634_s8 + $0x74] ss:$8 sps:$4 sm:$0xff]  }
 0x195   :  { %v119_v43 = vsub.f32 %v112_v31, %v118_v41  ;;  %v199_v46 = vsel %vm191_vm4, %v198_v45, 0.0  ;;  %v3262_v31 = vld [vmem:[%s4632_s6 + $0x60] sm:$0xff]   ;;  %v3878_v41 = vsub.s32 0, %v3875_v40 }
 0x197   :  { %v120_v44 = vmul.f32 %v119_v43, %v119_v43 }
 0x199   :  { %121 = vadd.xlane.f32.xlu1 %v120_v44  ;;  %v3884_v44 = vsub.s32 1, %v3875_v40 }
 0x19d   :  { %200 = vadd.xlane.f32.xlu1 %v199_v46 }
 0x226   :  { %v122_v4 = vpop.xlane.xlu1 %121 }
 0x227   :  { %v123_v5 = vmul.f32 0.0078125, %v122_v4  ;;  %v3274_v4 = vld [vmem:[%s4633_s7 + $0x20] sm:$0xff]  }
 0x229   :  { %v124_v6 = vadd.f32 1e-05, %v123_v5  ;;  %v3275_v5 = vld [vmem:[%s4633_s7 + $0x28] sm:$0xff]  }
 0x22a   :  { %v201_v7 = vpop.xlane.xlu1 %200 }
 0x22b   :  { %3560 = vrsqrt.f32 %v124_v6  ;;  %v202_v8 = vmul.f32 0.015625, %v201_v7  ;;  %v3276_v6 = vld [vmem:[%s4633_s7 + $0x30] sm:$0xff]   ;;  %v3277_v7 = vld [vmem:[%s4633_s7 + $0x38] sm:$0xff]  }
 0x22d   :  { %v203_v9 = vadd.f32 1e-05, %v202_v8 }
 0x22f   :  { %3562 = vrsqrt.f32 %v203_v9  ;;  %v490_v9 = vld [vmem:[%s4629_s13 + $0x7] ss:$0 sm:$0xff] }
 0x235   :  { %v3561_v10 = vpop.eup %3560 }
 0x236   :  { %v126_v12 = vmul.f32 %v3561_v10, %v119_v43  ;;  %v2829_v43 = vld [vmem:[%s4629_s13 + $0x6] ss:$8 sm:$0x3] }
 0x237   :  { %v445_v48 = vrot.slane %v2829_v43, %v3878_v41  ;;  %v449_v50 = vrot.slane %v2829_v43, %v3884_v44  ;;  %v3302_v43 = vld [vmem:[%s4635_s9] ss:$16 sps:$4 sm:$0xff]  }
 0x238   :  { %v127_v14 = vmul.f32 %v126_v12, %v113_v11 }
 0x239   :  { %v3563_v15 = vpop.eup %3562 }
 0x23a   :  { %v205_v17 = vmul.f32 %v3563_v15, %v3749_v42  ;;  %v128_v18 = vadd.f32 %v127_v14, %v114_v13 }
 0x23c   :  { %v208_v20 = vpack.c.bf16 %v128_v18, %v128_v18  ;;  %v206_v21 = vmul.f32 %v205_v17, %v189_v16 }
 0x23e   :  { %431 = vmatmul.mubr.bf16.vlgmr.msra.gmra.mrb[8].mxu0 %v208_v20  ;;  %v207_v22 = vadd.f32 %v206_v21, %v190_v19 }
 0x23f   :  { %3189 = vmatprep.mubr.msk.bf16.mxu0 %vm3625_vm0, %v3624_v0  ;;  %3174 = vmatpush3.bf16.msra.mxu0 %v3270_v62 }
 0x240   :  { %v225_v24 = vpack.c.bf16 %v207_v22, %v207_v22  ;;  %3175 = vmatprep.subr.bf16.mxu0 %v3624_v0 }
 0x242   :  { %2812 = vmatmul.mubr.msk.bf16.vlgmr.msra.gmra.mrb[0].mxu1 %vm191_vm4, %v225_v24 }
 0x243   :  { %3076 = vmatpush3.bf16.msra.mxu1 %v3255_v23  ;;  %3176 = vmatpush3.bf16.msra.mxu0 %v3271_v63  ;;  %v743_v63 = vld [vmem:[%s4629_s13 + $0x21] ss:$0 sm:$0xff] }
 0x244   :  { %3077 = vmatprep.subr.bf16.mxu1 %v3256_v25  ;;  %3177 = vmatprep.subr.bf16.mxu0 %v3624_v0  ;;  %v3280_v25 = vld [vmem:[%s4634_s8 + $0x4] ss:$8 sps:$4 sm:$0xff]  }
 0x247   :  { %3078 = vmatpush3.bf16.msra.mxu1 %v3257_v26  ;;  %3178 = vmatpush3.bf16.msra.mxu0 %v3272_v2  ;;  %v3278_v26 = vld [vmem:[%s4634_s8] ss:$8 sps:$4 sm:$0xff]  }
 0x248   :  { %3079 = vmatprep.subr.bf16.mxu1 %v3258_v27  ;;  %3179 = vmatprep.subr.bf16.mxu0 %v3624_v0  ;;  %v3283_v27 = vld [vmem:[%s4634_s8 + $0x14] ss:$8 sps:$4 sm:$0xff]  }
 0x24b   :  { %3080 = vmatpush3.bf16.msra.mxu1 %v3259_v28  ;;  %3180 = vmatpush3.bf16.msra.mxu0 %v3273_v3  ;;  %v3281_v28 = vld [vmem:[%s4634_s8 + $0x10] ss:$8 sps:$4 sm:$0xff]  }
 0x24c   :  { %3081 = vmatprep.subr.bf16.mxu1 %v3260_v29  ;;  %3181 = vmatprep.subr.bf16.mxu0 %v3624_v0  ;;  %v3286_v29 = vld [vmem:[%s4634_s8 + $0x24] ss:$8 sps:$4 sm:$0xff]  }
 0x24f   :  { %3082 = vmatpush3.bf16.msra.mxu1 %v3261_v30  ;;  %3182 = vmatpush3.bf16.msra.mxu0 %v3274_v4  ;;  %v3284_v30 = vld [vmem:[%s4634_s8 + $0x20] ss:$8 sps:$4 sm:$0xff]  }
 0x250   :  { %3083 = vmatprep.subr.bf16.mxu1 %v3262_v31  ;;  %3183 = vmatprep.subr.bf16.mxu0 %v3624_v0  ;;  %v3287_v31 = vld [vmem:[%s4634_s8 + $0x30] ss:$8 sps:$4 sm:$0xff]  }
 0x253   :  { %3084 = vmatpush3.bf16.msra.mxu1 %v3263_v32  ;;  %3184 = vmatpush3.bf16.msra.mxu0 %v3275_v5  ;;  %v3289_v32 = vld [vmem:[%s4634_s8 + $0x34] ss:$8 sps:$4 sm:$0xff]  }
 0x254   :  { %3085 = vmatprep.subr.bf16.mxu1 %v3264_v33  ;;  %3185 = vmatprep.subr.bf16.mxu0 %v3624_v0  ;;  %v3292_v33 = vld [vmem:[%s4634_s8 + $0x44] ss:$8 sps:$4 sm:$0xff]  }
 0x257   :  { %3086 = vmatpush3.bf16.msra.mxu1 %v3265_v34  ;;  %3186 = vmatpush3.bf16.msra.mxu0 %v3276_v6  ;;  %v3290_v34 = vld [vmem:[%s4634_s8 + $0x40] ss:$8 sps:$4 sm:$0xff]  }
 0x258   :  { %3087 = vmatprep.subr.bf16.mxu1 %v3266_v35  ;;  %3187 = vmatprep.subr.bf16.mxu0 %v3624_v0  ;;  %v3295_v35 = vld [vmem:[%s4634_s8 + $0x54] ss:$8 sps:$4 sm:$0xff]  }
 0x25b   :  { %3088 = vmatpush3.bf16.msra.mxu1 %v3267_v36  ;;  %3188 = vmatpush3.bf16.msra.mxu0 %v3277_v7  ;;  %v3293_v36 = vld [vmem:[%s4634_s8 + $0x50] ss:$8 sps:$4 sm:$0xff]  }
 0x25c   :  { %3089 = vmatprep.subr.bf16.mxu1 %v3268_v37  ;;  %v3298_v37 = vld [vmem:[%s4634_s8 + $0x64] ss:$8 sps:$4 sm:$0xff]  }
 0x25f   :  { %3090 = vmatpush3.bf16.msra.mxu1 %v3269_v38  ;;  %v3296_v38 = vld [vmem:[%s4634_s8 + $0x60] ss:$8 sps:$4 sm:$0xff]  }
 0x260   :  { %851 = vmatprep.subr.bf16.mxu1 %v3280_v25  ;;  %v3331_v25 = vld [vmem:[%s4635_s9 + $0x8c] ss:$16 sps:$4 sm:$0xff]  }
 0x311   :  { %v432_v42 = vpop.f32.mrb[8].mxu0 }
 0x312   :  { %v434_v45 = vpop.f32.mrb[9].mxu0 }
 0x313   :  { %v436_v46 = vpop.f32.mrb[10].mxu0 }
 0x314   :  { %v437_v47 = vpop.f32.mrb[11].mxu0  ;;  %v3307_v46 = vld [vmem:[%s4635_s9 + $0xc] ss:$16 sps:$4 sm:$0xff]  }
 0x315   :  { %v311_v49 = vpop.f32.mrb[0].mxu1  ;;  %v3310_v47 = vld [vmem:[%s4635_s9 + $0x24] ss:$16 sps:$4 sm:$0xff]  }
 0x316   :  { %v433_v51 = vadd.f32 %v432_v42, %v311_v49  ;;  %v313_v52 = vpop.f32.mrb[1].mxu1  ;;  %v3299_v42 = vld [vmem:[%s4634_s8 + $0x70] ss:$8 sps:$4 sm:$0xff]   ;;  %v3316_v49 = vld [vmem:[%s4635_s9 + $0x44] ss:$16 sps:$4 sm:$0xff]  }
 0x317   :  { %v435_v53 = vadd.f32 %v434_v45, %v313_v52  ;;  %v315_v54 = vpop.f32.mrb[2].mxu1  ;;  %v3304_v45 = vld [vmem:[%s4635_s9 + $0x4] ss:$16 sps:$4 sm:$0xff]   ;;  %v3320_v52 = vld [vmem:[%s4635_s9 + $0x60] ss:$16 sps:$4 sm:$0xff]  }
 0x318   :  { %v452_v55 = vadd.f32 %v445_v48, %v433_v51  ;;  %v316_v56 = vpop.f32.mrb[3].mxu1  ;;  %1326 = vmatprep.subr.bf16.mxu0 %v3304_v45  ;;  %v3308_v48 = vld [vmem:[%s4635_s9 + $0x20] ss:$16 sps:$4 sm:$0xff]   ;;  %v3322_v51 = vld [vmem:[%s4635_s9 + $0x64] ss:$16 sps:$4 sm:$0xff]  }
 0x319   :  { %v453_v57 = vadd.f32 %v449_v50, %v435_v53  ;;  %v3314_v50 = vld [vmem:[%s4635_s9 + $0x40] ss:$16 sps:$4 sm:$0xff]   ;;  %v3328_v53 = vld [vmem:[%s4635_s9 + $0x84] ss:$16 sps:$4 sm:$0xff]   ;;  %v3367_v45 = vld [vmem:[%s4635_s9 + $0x14c] ss:$16 sps:$4 sm:$0xff]  }
 0x31a   :  { %v454_v58 = vmax.f32 %v452_v55, 0.0  ;;  %v3326_v54 = vld [vmem:[%s4635_s9 + $0x80] ss:$16 sps:$4 sm:$0xff]   ;;  %v3334_v55 = vld [vmem:[%s4635_s9 + $0xa4] ss:$16 sps:$4 sm:$0xff]  }
 0x31b   :  { %v455_v59 = vmax.f32 %v453_v57, 0.0  ;;  %v3332_v56 = vld [vmem:[%s4635_s9 + $0xa0] ss:$16 sps:$4 sm:$0xff]   ;;  %v3340_v57 = vld [vmem:[%s4635_s9 + $0xc4] ss:$16 sps:$4 sm:$0xff]  }
 0x31c   :  { %v456_v61 = vpack.c.bf16 %v454_v58, %v454_v58  ;;  %v3338_v58 = vld [vmem:[%s4635_s9 + $0xc0] ss:$16 sps:$4 sm:$0xff]  }
 0x31d   :  { %v457_v60 = vpack.c.bf16 %v455_v59, %v455_v59  ;;  %v3346_v59 = vld [vmem:[%s4635_s9 + $0xe4] ss:$16 sps:$4 sm:$0xff]  }
 0x31f   :  { %619 = vmatprep.mubr.bf16.mxu1 %v457_v60  ;;  %v3344_v60 = vld [vmem:[%s4635_s9 + $0xe0] ss:$16 sps:$4 sm:$0xff]  }
 0x320   :  { %620 = vmatmul.mubr.bf16.vlgmr.msra.gmra.mrb[4].mxu1 %v456_v61  ;;  %v741_v61 = vld [vmem:[%s4629_s13 + $0x20] ss:$0 sm:$0xff] }
 0x321   :  { %883 = vmatprep.mubr.bf16.mxu1 %v3626_v1  ;;  %852 = vmatpush1.bf16.msra.mxu1 %v3278_v26  ;;  %v3329_v26 = vld [vmem:[%s4635_s9 + $0x88] ss:$16 sps:$4 sm:$0xff]  }
 0x322   :  { %853 = vmatprep.subr.bf16.mxu1 %v3283_v27  ;;  %v3337_v27 = vld [vmem:[%s4635_s9 + $0xac] ss:$16 sps:$4 sm:$0xff]  }
 0x325   :  { %854 = vmatpush1.bf16.msra.mxu1 %v3281_v28  ;;  %v3335_v28 = vld [vmem:[%s4635_s9 + $0xa8] ss:$16 sps:$4 sm:$0xff]  }
 0x326   :  { %855 = vmatprep.subr.bf16.mxu1 %v3286_v29  ;;  %v3343_v29 = vld [vmem:[%s4635_s9 + $0xcc] ss:$16 sps:$4 sm:$0xff]  }
 0x329   :  { %856 = vmatpush1.bf16.msra.mxu1 %v3284_v30  ;;  %v3341_v30 = vld [vmem:[%s4635_s9 + $0xc8] ss:$16 sps:$4 sm:$0xff]  }
 0x32a   :  { %857 = vmatprep.subr.bf16.mxu1 %v3289_v32  ;;  %v3347_v32 = vld [vmem:[%s4635_s9 + $0xe8] ss:$16 sps:$4 sm:$0xff]  }
 0x32d   :  { %858 = vmatpush1.bf16.msra.mxu1 %v3287_v31  ;;  %v3349_v31 = vld [vmem:[%s4635_s9 + $0xec] ss:$16 sps:$4 sm:$0xff]  }
 0x32e   :  { %859 = vmatprep.subr.bf16.mxu1 %v3292_v33  ;;  %v3352_v33 = vld [vmem:[%s4635_s9 + $0x104] ss:$16 sps:$4 sm:$0xff]  }
 0x331   :  { %860 = vmatpush1.bf16.msra.mxu1 %v3290_v34  ;;  %v3350_v34 = vld [vmem:[%s4635_s9 + $0x100] ss:$16 sps:$4 sm:$0xff]  }
 0x332   :  { %861 = vmatprep.subr.bf16.mxu1 %v3295_v35  ;;  %v3353_v35 = vld [vmem:[%s4635_s9 + $0x108] ss:$16 sps:$4 sm:$0xff]  }
 0x335   :  { %862 = vmatpush1.bf16.msra.mxu1 %v3293_v36  ;;  %v3355_v36 = vld [vmem:[%s4635_s9 + $0x10c] ss:$16 sps:$4 sm:$0xff]  }
 0x336   :  { %863 = vmatprep.subr.bf16.mxu1 %v3298_v37  ;;  %v3358_v37 = vld [vmem:[%s4635_s9 + $0x124] ss:$16 sps:$4 sm:$0xff]  }
 0x339   :  { %864 = vmatpush1.bf16.msra.mxu1 %v3296_v38  ;;  %v3361_v38 = vld [vmem:[%s4635_s9 + $0x12c] ss:$16 sps:$4 sm:$0xff]  }
 0x33a   :  { %865 = vmatprep.subr.bf16.mxu1 %v3301_v39  ;;  %v3356_v39 = vld [vmem:[%s4635_s9 + $0x120] ss:$16 sps:$4 sm:$0xff]  }
 0x33d   :  { %866 = vmatpush1.bf16.msra.mxu1 %v3299_v42  ;;  %v3359_v42 = vld [vmem:[%s4635_s9 + $0x128] ss:$16 sps:$4 sm:$0xff]  }
 0x33e   :  { %1367 = vmatprep.subr.bf16.mxu1 %v3307_v46  ;;  %v3362_v46 = vld [vmem:[%s4635_s9 + $0x140] ss:$16 sps:$4 sm:$0xff]  }
 0x3f3   :  { %v3091_v8 = vpop.f32.mrb[4].mxu1 }
 0x3f4   :  { %v3092_v10 = vpop.f32.mrb[5].mxu1 }
 0x3f5   :  { %v3093_v11 = vadd.f32 %v3092_v10, %v3091_v8  ;;  %v3094_v12 = vpop.f32.mrb[6].mxu1 }
 0x3f6   :  { %v3095_v13 = vpop.f32.mrb[7].mxu1 }
 0x3f7   :  { %v622_v14 = vadd.f32 %v3093_v11, %v490_v9 }
 0x3f9   :  { %v628_v15 = vmul.f32 0.044715, %v622_v14  ;;  %v627_v21 = vmul.f32 0.5, %v622_v14 }
 0x3fb   :  { %v629_v16 = vmul.f32 %v628_v15, %v622_v14 }
 0x3fd   :  { %v630_v17 = vmul.f32 %v629_v16, %v622_v14  ;;  %v3305_v16 = vld [vmem:[%s4635_s9 + $0x8] ss:$16 sps:$4 sm:$0xff]  }
 0x3ff   :  { %v631_v18 = vadd.f32 %v630_v17, %v622_v14 }
 0x401   :  { %v632_v19 = vmul.f32 0.7978846, %v631_v18  ;;  %v3313_v18 = vld [vmem:[%s4635_s9 + $0x2c] ss:$16 sps:$4 sm:$0xff]  }
 0x403   :  { %3564 = vtanh.f32 %v632_v19  ;;  %v3311_v19 = vld [vmem:[%s4635_s9 + $0x28] ss:$16 sps:$4 sm:$0xff]  }
 0x40d   :  { %v3565_v20 = vpop.eup %3564 }
 0x40e   :  { %v634_v22 = vadd.f32 1.0, %v3565_v20  ;;  %v3319_v20 = vld [vmem:[%s4635_s9 + $0x4c] ss:$16 sps:$4 sm:$0xff]  }
 0x410   :  { %v3923_v23 = vmul.f32 %v634_v22, %v627_v21  ;;  %v3317_v21 = vld [vmem:[%s4635_s9 + $0x48] ss:$16 sps:$4 sm:$0xff]   ;;  %v3325_v22 = vld [vmem:[%s4635_s9 + $0x6c] ss:$16 sps:$4 sm:$0xff]  }
 0x412   :  { %v636_v24 = vpack.c.bf16 %v3923_v23, %v3923_v23 }
 0x414   :  { %3190 = vmatmul.mubr.bf16.vlgmr.msra.gmra.mrb[12].mxu0 %v636_v24  ;;  %v3323_v24 = vld [vmem:[%s4635_s9 + $0x68] ss:$16 sps:$4 sm:$0xff]  }
 0x415   :  { %1327 = vmatpush1.bf16.msra.mxu0 %v3302_v43  ;;  %v3364_v43 = vld [vmem:[%s4635_s9 + $0x144] ss:$16 sps:$4 sm:$0xff]  }
 0x416   :  { %1328 = vmatprep.subr.bf16.mxu0 %v3310_v47  ;;  %v3365_v47 = vld [vmem:[%s4635_s9 + $0x148] ss:$16 sps:$4 sm:$0xff]  }
 0x419   :  { %1329 = vmatpush1.bf16.msra.mxu0 %v3308_v48  ;;  %v3370_v48 = vld [vmem:[%s4635_s9 + $0x164] ss:$16 sps:$4 sm:$0xff]  }
 0x41a   :  { %1330 = vmatprep.subr.bf16.mxu0 %v3316_v49  ;;  %v3373_v49 = vld [vmem:[%s4635_s9 + $0x16c] ss:$16 sps:$4 sm:$0xff]  }
 0x41d   :  { %1331 = vmatpush1.bf16.msra.mxu0 %v3314_v50  ;;  %v3368_v50 = vld [vmem:[%s4635_s9 + $0x160] ss:$16 sps:$4 sm:$0xff]  }
 0x41e   :  { %1332 = vmatprep.subr.bf16.mxu0 %v3322_v51  ;;  %v3371_v51 = vld [vmem:[%s4635_s9 + $0x168] ss:$16 sps:$4 sm:$0xff]  }
 0x421   :  { %1333 = vmatpush1.bf16.msra.mxu0 %v3320_v52  ;;  %v3376_v52 = vld [vmem:[%s4635_s9 + $0x184] ss:$16 sps:$4 sm:$0xff]  }
 0x422   :  { %1334 = vmatprep.subr.bf16.mxu0 %v3328_v53  ;;  %v3379_v53 = vld [vmem:[%s4635_s9 + $0x18c] ss:$16 sps:$4 sm:$0xff]  }
 0x425   :  { %1335 = vmatpush1.bf16.msra.mxu0 %v3326_v54  ;;  %v3374_v54 = vld [vmem:[%s4635_s9 + $0x180] ss:$16 sps:$4 sm:$0xff]  }
 0x426   :  { %1336 = vmatprep.subr.bf16.mxu0 %v3334_v55  ;;  %v3377_v55 = vld [vmem:[%s4635_s9 + $0x188] ss:$16 sps:$4 sm:$0xff]  }
 0x429   :  { %1337 = vmatpush1.bf16.msra.mxu0 %v3332_v56  ;;  %v3382_v56 = vld [vmem:[%s4635_s9 + $0x1a4] ss:$16 sps:$4 sm:$0xff]  }
 0x42a   :  { %1338 = vmatprep.subr.bf16.mxu0 %v3340_v57  ;;  %v3385_v57 = vld [vmem:[%s4635_s9 + $0x1ac] ss:$16 sps:$4 sm:$0xff]  }
 0x42d   :  { %1339 = vmatpush1.bf16.msra.mxu0 %v3338_v58  ;;  %v3380_v58 = vld [vmem:[%s4635_s9 + $0x1a0] ss:$16 sps:$4 sm:$0xff]  }
 0x42e   :  { %1340 = vmatprep.subr.bf16.mxu0 %v3346_v59  ;;  %v3383_v59 = vld [vmem:[%s4635_s9 + $0x1a8] ss:$16 sps:$4 sm:$0xff]  }
 0x431   :  { %1341 = vmatpush1.bf16.msra.mxu0 %v3344_v60  ;;  %v3388_v60 = vld [vmem:[%s4635_s9 + $0x1c4] ss:$16 sps:$4 sm:$0xff]  }
 0x432   :  { %1342 = vmatprep.subr.bf16.mxu0 %v3352_v33 }
 0x435   :  { %1343 = vmatpush1.bf16.msra.mxu0 %v3350_v34 }
 0x436   :  { %1344 = vmatprep.subr.bf16.mxu0 %v3358_v37 }
 0x439   :  { %1345 = vmatpush1.bf16.msra.mxu0 %v3356_v39 }
 0x43a   :  { %1346 = vmatprep.subr.bf16.mxu0 %v3364_v43  ;;  %v3398_v43 = vld [vmem:[%s4636_s10 + $0x40] sm:$0xff]  }
 0x43d   :  { %1347 = vmatpush1.bf16.msra.mxu0 %v3362_v46  ;;  %v3400_v46 = vld [vmem:[%s4636_s10] sm:$0xff]  }
 0x43e   :  { %1348 = vmatprep.subr.bf16.mxu0 %v3370_v48  ;;  %v3402_v48 = vld [vmem:[%s4636_s10 + $0x48] sm:$0xff]  }
 0x441   :  { %1349 = vmatpush1.bf16.msra.mxu0 %v3368_v50  ;;  %v3404_v50 = vld [vmem:[%s4636_s10 + $0x8] sm:$0xff]  }
 0x442   :  { %1350 = vmatprep.subr.bf16.mxu0 %v3376_v52  ;;  %v3406_v52 = vld [vmem:[%s4636_s10 + $0x50] sm:$0xff]  }
 0x445   :  { %1351 = vmatpush1.bf16.msra.mxu0 %v3374_v54  ;;  %v3408_v54 = vld [vmem:[%s4636_s10 + $0x10] sm:$0xff]  }
 0x446   :  { %1352 = vmatprep.subr.bf16.mxu0 %v3382_v56  ;;  %v3410_v56 = vld [vmem:[%s4636_s10 + $0x58] sm:$0xff]  }
 0x449   :  { %1353 = vmatpush1.bf16.msra.mxu0 %v3380_v58  ;;  %v3412_v58 = vld [vmem:[%s4636_s10 + $0x18] sm:$0xff]  }
 0x44a   :  { %1354 = vmatprep.subr.bf16.mxu0 %v3388_v60  ;;  %v3414_v60 = vld [vmem:[%s4636_s10 + $0x60] sm:$0xff]  }
 0x4e7   :  { %v735_v62 = vpop.f32.mrb[12].mxu0 }
 0x4e8   :  { %v742_v2 = vmul.f32 %v741_v61, %v735_v62  ;;  %v3191_v3 = vpop.f32.mrb[13].mxu0  ;;  %v3391_v61 = vld [vmem:[%s4635_s9 + $0x1cc] ss:$16 sps:$4 sm:$0xff]   ;;  %v3386_v62 = vld [vmem:[%s4635_s9 + $0x1c0] ss:$16 sps:$4 sm:$0xff]  }
 0x4e9   :  { %v738_v4 = vpop.f32.mrb[14].mxu0  ;;  %v3397_v3 = vld [vmem:[%s4635_s9 + $0x1ec] ss:$16 sps:$4 sm:$0xff]   ;;  %1355 = vmatpush1.bf16.msra.mxu0 %v3386_v62  ;;  %v3416_v62 = vld [vmem:[%s4636_s10 + $0x20] sm:$0xff]  }
 0x4ea   :  { %v744_v5 = vadd.f32 %v743_v63, %v742_v2  ;;  %v3192_v6 = vpop.f32.mrb[15].mxu0  ;;  %v3389_v63 = vld [vmem:[%s4635_s9 + $0x1c8] ss:$16 sps:$4 sm:$0xff]   ;;  %v3394_v2 = vld [vmem:[%s4635_s9 + $0x1e4] ss:$16 sps:$4 sm:$0xff]  }
 0x4eb   :  { %v3392_v4 = vld [vmem:[%s4635_s9 + $0x1e0] ss:$16 sps:$4 sm:$0xff]   ;;  %1356 = vmatprep.subr.bf16.mxu0 %v3394_v2  ;;  %v3418_v2 = vld [vmem:[%s4636_s10 + $0x68] sm:$0xff]  }
 0x4ec   :  { %v746_v7 = vmul.f32 0.044715, %v744_v5  ;;  %v745_v13 = vmul.f32 0.5, %v744_v5  ;;  %v2870_v6 = vld [vmem:[%s4629_s13 + $0x22] ss:$8 sm:$0x3] }
 0x4ed   :  { %1357 = vmatpush1.bf16.msra.mxu0 %v3392_v4  ;;  %v3420_v4 = vld [vmem:[%s4636_s10 + $0x28] sm:$0xff]  }
 0x4ee   :  { %v747_v8 = vmul.f32 %v746_v7, %v744_v5  ;;  %v2871_v7 = vld [vmem:[%s4629_s13 + $0x23] ss:$8 sm:$0x3]  ;;  %3106 = vmatprep.subr.bf16.mxu0 %v3398_v43 }
 0x4f0   :  { %v748_v9 = vmul.f32 %v747_v8, %v744_v5  ;;  %v898_v8 = vrot.slane %v2870_v6, %v3878_v41 }
 0x4f2   :  { %v749_v10 = vadd.f32 %v748_v9, %v744_v5  ;;  %v3395_v5 = vld [vmem:[%s4635_s9 + $0x1e8] ss:$16 sps:$4 sm:$0xff]   ;;  %v902_v9 = vrot.slane %v2870_v6, %v3884_v44  ;;  %v3422_v6 = vld [vmem:[%s4636_s10 + $0x70] sm:$0xff]  }
 0x4f4   :  { %v750_v11 = vmul.f32 0.7978846, %v749_v10  ;;  %v913_v10 = vrot.slane %v2871_v7, %v3878_v41 }
 0x4f6   :  { %3566 = vtanh.f32 %v750_v11 }
 0x500   :  { %v3567_v12 = vpop.eup %3566 }
 0x501   :  { %v752_v14 = vadd.f32 1.0, %v3567_v12  ;;  %v917_v12 = vrot.slane %v2871_v7, %v3884_v44  ;;  %v3423_v7 = vld [vmem:[%s4636_s10 + $0xf0] sm:$0xff]  }
 0x503   :  { %v753_v15 = vmul.f32 %v752_v14, %v745_v13 }
 0x505   :  { %v754_v17 = vpack.c.bf16 %v753_v15, %v753_v15 }
 0x507   :  { %884 = vmatmul.mubr.bf16.vlgmr.msra.gmra.mrb[8].mxu1 %v754_v17 }
 0x508   :  { %1368 = vmatpush1.bf16.msra.mxu1 %v3305_v16 }
 0x509   :  { %1369 = vmatprep.subr.bf16.mxu1 %v3313_v18 }
 0x50c   :  { %1370 = vmatpush1.bf16.msra.mxu1 %v3311_v19 }
 0x50d   :  { %1371 = vmatprep.subr.bf16.mxu1 %v3319_v20 }
 0x510   :  { %1372 = vmatpush1.bf16.msra.mxu1 %v3317_v21 }
 0x511   :  { %1373 = vmatprep.subr.bf16.mxu1 %v3325_v22 }
 0x514   :  { %1374 = vmatpush1.bf16.msra.mxu1 %v3323_v24 }
 0x515   :  { %1375 = vmatprep.subr.bf16.mxu1 %v3331_v25 }
 0x518   :  { %1376 = vmatpush1.bf16.msra.mxu1 %v3329_v26 }
 0x519   :  { %1377 = vmatprep.subr.bf16.mxu1 %v3337_v27 }
 0x51c   :  { %1378 = vmatpush1.bf16.msra.mxu1 %v3335_v28 }
 0x51d   :  { %1379 = vmatprep.subr.bf16.mxu1 %v3343_v29 }
 0x520   :  { %1380 = vmatpush1.bf16.msra.mxu1 %v3341_v30 }
 0x521   :  { %1381 = vmatprep.subr.bf16.mxu1 %v3349_v31 }
 0x524   :  { %1382 = vmatpush1.bf16.msra.mxu1 %v3347_v32 }
 0x525   :  { %1383 = vmatprep.subr.bf16.mxu1 %v3355_v36 }
 0x528   :  { %1384 = vmatpush1.bf16.msra.mxu1 %v3353_v35 }
 0x529   :  { %1385 = vmatprep.subr.bf16.mxu1 %v3361_v38 }
 0x52c   :  { %1386 = vmatpush1.bf16.msra.mxu1 %v3359_v42 }
 0x52d   :  { %1387 = vmatprep.subr.bf16.mxu1 %v3367_v45  ;;  %v3399_v45 = vld [vmem:[%s4636_s10 + $0xc0] sm:$0xff]  }
 0x530   :  { %1388 = vmatpush1.bf16.msra.mxu1 %v3365_v47  ;;  %v3401_v47 = vld [vmem:[%s4636_s10 + $0x80] sm:$0xff]  }
 0x531   :  { %1389 = vmatprep.subr.bf16.mxu1 %v3373_v49  ;;  %v3403_v49 = vld [vmem:[%s4636_s10 + $0xc8] sm:$0xff]  }
 0x534   :  { %1390 = vmatpush1.bf16.msra.mxu1 %v3371_v51  ;;  %v3405_v51 = vld [vmem:[%s4636_s10 + $0x88] sm:$0xff]  }
 0x535   :  { %1391 = vmatprep.subr.bf16.mxu1 %v3379_v53  ;;  %v3407_v53 = vld [vmem:[%s4636_s10 + $0xd0] sm:$0xff]  }
 0x538   :  { %1392 = vmatpush1.bf16.msra.mxu1 %v3377_v55  ;;  %v3409_v55 = vld [vmem:[%s4636_s10 + $0x90] sm:$0xff]  }
 0x539   :  { %1393 = vmatprep.subr.bf16.mxu1 %v3385_v57  ;;  %v3411_v57 = vld [vmem:[%s4636_s10 + $0xd8] sm:$0xff]  }
 0x53c   :  { %1394 = vmatpush1.bf16.msra.mxu1 %v3383_v59  ;;  %v3413_v59 = vld [vmem:[%s4636_s10 + $0x98] sm:$0xff]  }
 0x53d   :  { %1395 = vmatprep.subr.bf16.mxu1 %v3391_v61  ;;  %v3415_v61 = vld [vmem:[%s4636_s10 + $0xe0] sm:$0xff]  }
 0x540   :  { %1396 = vmatpush1.bf16.msra.mxu1 %v3389_v63  ;;  %v3417_v63 = vld [vmem:[%s4636_s10 + $0xa0] sm:$0xff]  }
 0x541   :  { %1397 = vmatprep.subr.bf16.mxu1 %v3397_v3  ;;  %v3419_v3 = vld [vmem:[%s4636_s10 + $0xe8] sm:$0xff]  }
 0x544   :  { %1398 = vmatpush1.bf16.msra.mxu1 %v3395_v5  ;;  %v3421_v5 = vld [vmem:[%s4636_s10 + $0xa8] sm:$0xff]  }
 0x545   :  { %3128 = vmatprep.subr.bf16.mxu1 %v3399_v45 }
 0x5da   :  { %v885_v11 = vpop.f32.mrb[8].mxu1 }
 0x5db   :  { %v905_v13 = vmul.f32 %v898_v8, %v885_v11  ;;  %v887_v14 = vpop.f32.mrb[9].mxu1  ;;  %v3424_v8 = vld [vmem:[%s4636_s10 + $0x30] sm:$0xff]   ;;  %v3427_v11 = vld [vmem:[%s4636_s10 + $0xf8] sm:$0xff]  }
 0x5dc   :  { %v906_v15 = vmul.f32 %v902_v9, %v887_v14  ;;  %v889_v16 = vpop.f32.mrb[10].mxu1  ;;  %v3425_v9 = vld [vmem:[%s4636_s10 + $0xb0] sm:$0xff]  }
 0x5dd   :  { %v920_v17 = vadd.f32 %v913_v10, %v905_v13  ;;  %v890_v18 = vpop.f32.mrb[11].mxu1  ;;  %v3426_v10 = vld [vmem:[%s4636_s10 + $0x78] sm:$0xff]   ;;  %v3432_v14 = vld [vmem:[%s4637_s11 + $0x4] ss:$44 sps:$4 sm:$0xff]   ;;  %v4286_v16 = vsub.s32 2, %v3875_v40 }
 0x5de   :  { %v921_v19 = vadd.f32 %v917_v12, %v906_v15  ;;  %v3428_v12 = vld [vmem:[%s4636_s10 + $0x38] sm:$0xff]   ;;  %v4292_v18 = vsub.s32 3, %v3875_v40 }
 0x5df   :  { %v924_v20 = vmul.f32 0.044715, %v920_v17  ;;  %v922_v33 = vmul.f32 0.5, %v920_v17  ;;  %v3429_v13 = vld [vmem:[%s4636_s10 + $0xb8] sm:$0xff]  }
 0x5e0   :  { %v925_v21 = vmul.f32 0.044715, %v921_v19  ;;  %v923_v35 = vmul.f32 0.5, %v921_v19  ;;  %v3435_v15 = vld [vmem:[%s4637_s11 + $0xc] ss:$44 sps:$4 sm:$0xff]  }
 0x5e1   :  { %v926_v22 = vmul.f32 %v924_v20, %v920_v17 }
 0x5e2   :  { %v927_v24 = vmul.f32 %v925_v21, %v921_v19 }
 0x5e3   :  { %v928_v25 = vmul.f32 %v926_v22, %v920_v17 }
 0x5e4   :  { %v929_v26 = vmul.f32 %v927_v24, %v921_v19 }
 0x5e5   :  { %v930_v27 = vadd.f32 %v928_v25, %v920_v17  ;;  %v2936_v17 = vld [vmem:[%s4629_s13 + $0x24] ss:$8 sm:$0xf] }
 0x5e6   :  { %v931_v28 = vadd.f32 %v929_v26, %v921_v19  ;;  %v2937_v19 = vld [vmem:[%s4629_s13 + $0x25] ss:$8 sm:$0xf]  ;;  %v1414_v20 = vrot.slane %v2936_v17, %v3878_v41  ;;  %v1422_v21 = vrot.slane %v2936_v17, %v4286_v16  ;;  %v1418_v22 = vrot.slane %v2936_v17, %v3884_v44 }
 0x5e7   :  { %v932_v29 = vmul.f32 0.7978846, %v930_v27  ;;  %v1426_v24 = vrot.slane %v2936_v17, %v4292_v18  ;;  %v1441_v25 = vrot.slane %v2937_v19, %v3878_v41  ;;  %v1449_v26 = vrot.slane %v2937_v19, %v4286_v16 }
 0x5e8   :  { %v933_v30 = vmul.f32 0.7978846, %v931_v28 }
 0x5e9   :  { %3568 = vtanh.f32 %v932_v29  ;;  %v1445_v29 = vrot.slane %v2937_v19, %v3884_v44 }
 0x5ea   :  { %3570 = vtanh.f32 %v933_v30  ;;  %v1453_v30 = vrot.slane %v2937_v19, %v4292_v18 }
 0x5f3   :  { %v3569_v31 = vpop.eup %3568 }
 0x5f4   :  { %v3571_v32 = vpop.eup %3570  ;;  %v936_v34 = vadd.f32 1.0, %v3569_v31 }
 0x5f5   :  { %v937_v36 = vadd.f32 1.0, %v3571_v32 }
 0x5f6   :  { %v938_v37 = vmul.f32 %v936_v34, %v922_v33 }
 0x5f7   :  { %v939_v38 = vmul.f32 %v937_v36, %v923_v35 }
 0x5f8   :  { %v940_v42 = vpack.c.bf16 %v938_v37, %v938_v37 }
 0x5f9   :  { %v941_v39 = vpack.c.bf16 %v939_v38, %v939_v38 }
 0x5fb   :  { %1358 = vmatprep.mubr.bf16.mxu0 %v941_v39  ;;  %1399 = vmatprep.mubr.bf16.mxu1 %v941_v39 }
 0x5fc   :  { %1359 = vmatmul.mubr.bf16.vlgmr.msra.gmra.mrb[16].mxu0 %v940_v42  ;;  %1400 = vmatmul.mubr.bf16.vlgmr.msra.gmra.mrb[12].mxu1 %v940_v42 }
 0x5fd   :  { %3107 = vmatpush3.bf16.msra.mxu0 %v3400_v46  ;;  %3129 = vmatpush3.bf16.msra.mxu1 %v3401_v47 }
 0x5fe   :  { %3108 = vmatprep.subr.bf16.mxu0 %v3402_v48  ;;  %3130 = vmatprep.subr.bf16.mxu1 %v3403_v49 }
 0x601   :  { %3109 = vmatpush3.bf16.msra.mxu0 %v3404_v50  ;;  %3131 = vmatpush3.bf16.msra.mxu1 %v3405_v51 }
 0x602   :  { %3110 = vmatprep.subr.bf16.mxu0 %v3406_v52  ;;  %3132 = vmatprep.subr.bf16.mxu1 %v3407_v53 }
 0x605   :  { %3111 = vmatpush3.bf16.msra.mxu0 %v3408_v54  ;;  %3133 = vmatpush3.bf16.msra.mxu1 %v3409_v55 }
 0x606   :  { %3112 = vmatprep.subr.bf16.mxu0 %v3410_v56  ;;  %3134 = vmatprep.subr.bf16.mxu1 %v3411_v57 }
 0x609   :  { %3113 = vmatpush3.bf16.msra.mxu0 %v3412_v58  ;;  %3135 = vmatpush3.bf16.msra.mxu1 %v3413_v59 }
 0x60a   :  { %3114 = vmatprep.subr.bf16.mxu0 %v3414_v60  ;;  %3136 = vmatprep.subr.bf16.mxu1 %v3415_v61 }
 0x60d   :  { %3115 = vmatpush3.bf16.msra.mxu0 %v3416_v62  ;;  %3137 = vmatpush3.bf16.msra.mxu1 %v3417_v63 }
 0x60e   :  { %3116 = vmatprep.subr.bf16.mxu0 %v3418_v2  ;;  %3138 = vmatprep.subr.bf16.mxu1 %v3419_v3 }
 0x611   :  { %3117 = vmatpush3.bf16.msra.mxu0 %v3420_v4  ;;  %3139 = vmatpush3.bf16.msra.mxu1 %v3421_v5 }
 0x612   :  { %3118 = vmatprep.subr.bf16.mxu0 %v3422_v6  ;;  %3140 = vmatprep.subr.bf16.mxu1 %v3423_v7 }
 0x615   :  { %3119 = vmatpush3.bf16.msra.mxu0 %v3424_v8  ;;  %3141 = vmatpush3.bf16.msra.mxu1 %v3425_v9 }
 0x616   :  { %3120 = vmatprep.subr.bf16.mxu0 %v3426_v10  ;;  %3142 = vmatprep.subr.bf16.mxu1 %v3427_v11 }
 0x619   :  { %3121 = vmatpush3.bf16.msra.mxu0 %v3428_v12  ;;  %3143 = vmatpush3.bf16.msra.mxu1 %v3429_v13 }
 0x61a   :  { %2444 = vmatprep.subr.bf16.mxu0 %v3432_v14  ;;  %2485 = vmatprep.subr.bf16.mxu1 %v3435_v15 }
 0x6cf   :  { %v1360_v27 = vpop.f32.mrb[16].mxu0  ;;  %v1401_v28 = vpop.f32.mrb[12].mxu1 }
 0x6d0   :  { %v1431_v31 = vmul.f32 %v1414_v20, %v1360_v27  ;;  %v1433_v32 = vmul.f32 %v1422_v21, %v1401_v28  ;;  %v1362_v33 = vpop.f32.mrb[17].mxu0  ;;  %v1403_v34 = vpop.f32.mrb[13].mxu1 }
 0x6d1   :  { %v1432_v35 = vmul.f32 %v1418_v22, %v1362_v33  ;;  %v1434_v36 = vmul.f32 %v1426_v24, %v1403_v34  ;;  %v1364_v37 = vpop.f32.mrb[18].mxu0  ;;  %v1405_v38 = vpop.f32.mrb[14].mxu1  ;;  %v3436_v33 = vld [vmem:[%s4637_s11 + $0x58] ss:$44 sps:$4 sm:$0xff]   ;;  %v3439_v34 = vld [vmem:[%s4637_s11 + $0x60] ss:$44 sps:$4 sm:$0xff]  }
 0x6d2   :  { %v1458_v39 = vadd.f32 %v1441_v25, %v1431_v31  ;;  %v1460_v42 = vadd.f32 %v1449_v26, %v1433_v32  ;;  %v1365_v43 = vpop.f32.mrb[19].mxu0  ;;  %v1406_v45 = vpop.f32.mrb[15].mxu1  ;;  %v3430_v26 = vld [vmem:[%s4637_s11] ss:$44 sps:$4 sm:$0xff]   ;;  %v3441_v32 = vld [vmem:[%s4637_s11 + $0x64] ss:$44 sps:$4 sm:$0xff]  }
 0x6d3   :  { %v1459_v46 = vadd.f32 %v1445_v29, %v1432_v35  ;;  %v1461_v47 = vadd.f32 %v1453_v30, %v1434_v36  ;;  %v3433_v29 = vld [vmem:[%s4637_s11 + $0x8] ss:$44 sps:$4 sm:$0xff]   ;;  %v3442_v37 = vld [vmem:[%s4637_s11 + $0xb0] ss:$44 sps:$4 sm:$0xff]   ;;  %v3445_v38 = vld [vmem:[%s4637_s11 + $0xb8] ss:$44 sps:$4 sm:$0xff]  }
 0x6d4   :  { %v1466_v48 = vmul.f32 0.044715, %v1458_v39  ;;  %v1468_v49 = vmul.f32 0.044715, %v1460_v42  ;;  %v1462_v8 = vmul.f32 0.5, %v1458_v39  ;;  %v1464_v20 = vmul.f32 0.5, %v1460_v42 }
 0x6d5   :  { %v1467_v50 = vmul.f32 0.044715, %v1459_v46  ;;  %v1469_v51 = vmul.f32 0.044715, %v1461_v47  ;;  %v1463_v11 = vmul.f32 0.5, %v1459_v46  ;;  %v1465_v14 = vmul.f32 0.5, %v1461_v47 }
 0x6d6   :  { %v1470_v52 = vmul.f32 %v1466_v48, %v1458_v39  ;;  %v1472_v53 = vmul.f32 %v1468_v49, %v1460_v42  ;;  %v3438_v30 = vld [vmem:[%s4637_s11 + $0x5c] ss:$44 sps:$4 sm:$0xff]   ;;  %v3444_v35 = vld [vmem:[%s4637_s11 + $0xb4] ss:$44 sps:$4 sm:$0xff]  }
 0x6d7   :  { %v1471_v54 = vmul.f32 %v1467_v50, %v1459_v46  ;;  %v1473_v55 = vmul.f32 %v1469_v51, %v1461_v47  ;;  %v3447_v36 = vld [vmem:[%s4637_s11 + $0xbc] ss:$44 sps:$4 sm:$0xff]   ;;  %v3454_v48 = vld [vmem:[%s4637_s11 + $0x160] ss:$44 sps:$4 sm:$0xff]   ;;  %v3465_v51 = vld [vmem:[%s4637_s11 + $0x1c4] ss:$44 sps:$4 sm:$0xff]  }
 0x6d8   :  { %v1474_v56 = vmul.f32 %v1470_v52, %v1458_v39  ;;  %v1476_v57 = vmul.f32 %v1472_v53, %v1460_v42  ;;  %v3448_v43 = vld [vmem:[%s4637_s11 + $0x108] ss:$44 sps:$4 sm:$0xff]   ;;  %v3451_v45 = vld [vmem:[%s4637_s11 + $0x110] ss:$44 sps:$4 sm:$0xff]   ;;  %v3460_v52 = vld [vmem:[%s4637_s11 + $0x1b8] ss:$44 sps:$4 sm:$0xff]  }
 0x6d9   :  { %v1475_v58 = vmul.f32 %v1471_v54, %v1459_v46  ;;  %v1477_v59 = vmul.f32 %v1473_v55, %v1461_v47  ;;  %v3457_v49 = vld [vmem:[%s4637_s11 + $0x168] ss:$44 sps:$4 sm:$0xff]   ;;  %v3463_v53 = vld [vmem:[%s4637_s11 + $0x1c0] ss:$44 sps:$4 sm:$0xff]  }
 0x6da   :  { %v1478_v60 = vadd.f32 %v1474_v56, %v1458_v39  ;;  %v1480_v61 = vadd.f32 %v1476_v57, %v1460_v42  ;;  %v3450_v39 = vld [vmem:[%s4637_s11 + $0x10c] ss:$44 sps:$4 sm:$0xff]   ;;  %v3453_v42 = vld [vmem:[%s4637_s11 + $0x114] ss:$44 sps:$4 sm:$0xff]   ;;  %v3462_v50 = vld [vmem:[%s4637_s11 + $0x1bc] ss:$44 sps:$4 sm:$0xff]  }
 0x6db   :  { %v1479_v62 = vadd.f32 %v1475_v58, %v1459_v46  ;;  %v1481_v63 = vadd.f32 %v1477_v59, %v1461_v47  ;;  %v3456_v46 = vld [vmem:[%s4637_s11 + $0x164] ss:$44 sps:$4 sm:$0xff]   ;;  %v3459_v47 = vld [vmem:[%s4637_s11 + $0x16c] ss:$44 sps:$4 sm:$0xff]   ;;  %v3468_v54 = vld [vmem:[%s4637_s11 + $0x214] ss:$44 sps:$4 sm:$0xff]  }
 0x6dc   :  { %v1482_v2 = vmul.f32 0.7978846, %v1478_v60  ;;  %v1484_v5 = vmul.f32 0.7978846, %v1480_v61  ;;  %v3471_v55 = vld [vmem:[%s4637_s11 + $0x21c] ss:$44 sps:$4 sm:$0xff]  }
 0x6dd   :  { %v1483_v3 = vmul.f32 0.7978846, %v1479_v62  ;;  %v1485_v4 = vmul.f32 0.7978846, %v1481_v63  ;;  %v3466_v56 = vld [vmem:[%s4637_s11 + $0x210] ss:$44 sps:$4 sm:$0xff]  }
 0x6de   :  { %3572 = vtanh.f32 %v1482_v2  ;;  %v3469_v57 = vld [vmem:[%s4637_s11 + $0x218] ss:$44 sps:$4 sm:$0xff]   ;;  %v3477_v59 = vld [vmem:[%s4637_s11 + $0x274] ss:$44 sps:$4 sm:$0xff]   ;;  %v3475_v61 = vld [vmem:[%s4637_s11 + $0x270] ss:$44 sps:$4 sm:$0xff]  }
 0x6df   :  { %3574 = vtanh.f32 %v1483_v3  ;;  %v3474_v58 = vld [vmem:[%s4637_s11 + $0x26c] ss:$44 sps:$4 sm:$0xff]   ;;  %v3472_v60 = vld [vmem:[%s4637_s11 + $0x268] ss:$44 sps:$4 sm:$0xff]  }
 0x6e0   :  { %3576 = vtanh.f32 %v1485_v4  ;;  %v3480_v62 = vld [vmem:[%s4637_s11 + $0x14] ss:$44 sps:$4 sm:$0xff]   ;;  %v3483_v63 = vld [vmem:[%s4637_s11 + $0x1c] ss:$44 sps:$4 sm:$0xff]   ;;  %v1566_v4 = vld [vmem:[%s4629_s13 + $0x26] ss:$0 sm:$0xff] }
 0x6e1   :  { %3578 = vtanh.f32 %v1484_v5 }
 0x6e8   :  { %v3573_v6 = vpop.eup %3572 }
 0x6e9   :  { %v3575_v7 = vpop.eup %3574  ;;  %v1490_v9 = vadd.f32 1.0, %v3573_v6 }
 0x6ea   :  { %v3577_v10 = vpop.eup %3576  ;;  %v1491_v12 = vadd.f32 1.0, %v3575_v7 }
 0x6eb   :  { %v3579_v13 = vpop.eup %3578  ;;  %v1493_v15 = vadd.f32 1.0, %v3577_v10  ;;  %v1494_v17 = vmul.f32 %v1490_v9, %v1462_v8 }
 0x6ec   :  { %v1495_v19 = vmul.f32 %v1491_v12, %v1463_v11  ;;  %v1492_v21 = vadd.f32 1.0, %v3579_v13 }
 0x6ed   :  { %v1497_v22 = vmul.f32 %v1493_v15, %v1465_v14  ;;  %v1498_v28 = vpack.c.bf16 %v1494_v17, %v1494_v17  ;;  %v3478_v17 = vld [vmem:[%s4637_s11 + $0x10] ss:$44 sps:$4 sm:$0xff]  }
 0x6ee   :  { %v1499_v24 = vpack.c.bf16 %v1495_v19, %v1495_v19  ;;  %v1496_v25 = vmul.f32 %v1492_v21, %v1464_v20  ;;  %v3481_v19 = vld [vmem:[%s4637_s11 + $0x18] ss:$44 sps:$4 sm:$0xff]  }
 0x6ef   :  { %v1501_v27 = vpack.c.bf16 %v1497_v22, %v1497_v22  ;;  %v3486_v21 = vld [vmem:[%s4637_s11 + $0x6c] ss:$44 sps:$4 sm:$0xff]   ;;  %v3489_v22 = vld [vmem:[%s4637_s11 + $0x74] ss:$44 sps:$4 sm:$0xff]  }
 0x6f0   :  { %1791 = vmatprep.mubr.bf16.mxu0 %v1499_v24  ;;  %v1500_v31 = vpack.c.bf16 %v1496_v25, %v1496_v25  ;;  %v3487_v24 = vld [vmem:[%s4637_s11 + $0x70] ss:$44 sps:$4 sm:$0xff]  }
 0x6f1   :  { %1831 = vmatprep.mubr.bf16.mxu1 %v1501_v27  ;;  %1792 = vmatmul.mubr.bf16.vlgmr.msra.gmra.mrb[20].mxu0 %v1498_v28  ;;  %v3492_v25 = vld [vmem:[%s4637_s11 + $0xc4] ss:$44 sps:$4 sm:$0xff]   ;;  %v3490_v27 = vld [vmem:[%s4637_s11 + $0xc0] ss:$44 sps:$4 sm:$0xff]   ;;  %v3493_v28 = vld [vmem:[%s4637_s11 + $0xc8] ss:$44 sps:$4 sm:$0xff]  }
 0x6f2   :  { %1832 = vmatmul.mubr.bf16.vlgmr.msra.gmra.mrb[16].mxu1 %v1500_v31  ;;  %2445 = vmatpush1.bf16.msra.mxu0 %v3430_v26  ;;  %v3495_v26 = vld [vmem:[%s4637_s11 + $0xcc] ss:$44 sps:$4 sm:$0xff]  }
 0x6f3   :  { %2486 = vmatpush1.bf16.msra.mxu1 %v3433_v29  ;;  %2446 = vmatprep.subr.bf16.mxu0 %v3438_v30  ;;  %v3498_v29 = vld [vmem:[%s4637_s11 + $0x11c] ss:$44 sps:$4 sm:$0xff]   ;;  %v3501_v30 = vld [vmem:[%s4637_s11 + $0x124] ss:$44 sps:$4 sm:$0xff]  }
 0x6f4   :  { %2487 = vmatprep.subr.bf16.mxu1 %v3441_v32  ;;  %2476 = vmatprep.mubr.bf16.mxu0 %v3626_v1  ;;  %v3496_v31 = vld [vmem:[%s4637_s11 + $0x118] ss:$44 sps:$4 sm:$0xff]   ;;  %v3499_v32 = vld [vmem:[%s4637_s11 + $0x120] ss:$44 sps:$4 sm:$0xff]  }
 0x6f5   :  { %2517 = vmatprep.mubr.bf16.mxu1 %v3626_v1 }
 0x6f6   :  { %2447 = vmatpush1.bf16.msra.mxu0 %v3436_v33  ;;  %v3504_v33 = vld [vmem:[%s4637_s11 + $0x174] ss:$44 sps:$4 sm:$0xff]  }
 0x6f7   :  { %2488 = vmatpush1.bf16.msra.mxu1 %v3439_v34  ;;  %2448 = vmatprep.subr.bf16.mxu0 %v3444_v35  ;;  %v3507_v34 = vld [vmem:[%s4637_s11 + $0x17c] ss:$44 sps:$4 sm:$0xff]  }
 0x6f8   :  { %2489 = vmatprep.subr.bf16.mxu1 %v3447_v36  ;;  %v3502_v35 = vld [vmem:[%s4637_s11 + $0x170] ss:$44 sps:$4 sm:$0xff]   ;;  %v3505_v36 = vld [vmem:[%s4637_s11 + $0x178] ss:$44 sps:$4 sm:$0xff]  }
 0x6fa   :  { %2449 = vmatpush1.bf16.msra.mxu0 %v3442_v37  ;;  %v3510_v37 = vld [vmem:[%s4637_s11 + $0x1cc] ss:$44 sps:$4 sm:$0xff]  }
 0x6fb   :  { %2490 = vmatpush1.bf16.msra.mxu1 %v3445_v38  ;;  %2450 = vmatprep.subr.bf16.mxu0 %v3450_v39  ;;  %v3513_v38 = vld [vmem:[%s4637_s11 + $0x1d4] ss:$44 sps:$4 sm:$0xff]  }
 0x6fc   :  { %2491 = vmatprep.subr.bf16.mxu1 %v3453_v42  ;;  %v3508_v39 = vld [vmem:[%s4637_s11 + $0x1c8] ss:$44 sps:$4 sm:$0xff]   ;;  %v3511_v42 = vld [vmem:[%s4637_s11 + $0x1d0] ss:$44 sps:$4 sm:$0xff]  }
 0x6fe   :  { %2451 = vmatpush1.bf16.msra.mxu0 %v3448_v43  ;;  %v3516_v43 = vld [vmem:[%s4637_s11 + $0x224] ss:$44 sps:$4 sm:$0xff]  }
 0x6ff   :  { %2492 = vmatpush1.bf16.msra.mxu1 %v3451_v45  ;;  %2452 = vmatprep.subr.bf16.mxu0 %v3456_v46  ;;  %v3519_v45 = vld [vmem:[%s4637_s11 + $0x22c] ss:$44 sps:$4 sm:$0xff]  }
 0x700   :  { %2493 = vmatprep.subr.bf16.mxu1 %v3459_v47  ;;  %v3514_v46 = vld [vmem:[%s4637_s11 + $0x220] ss:$44 sps:$4 sm:$0xff]   ;;  %v3517_v47 = vld [vmem:[%s4637_s11 + $0x228] ss:$44 sps:$4 sm:$0xff]  }
 0x702   :  { %2453 = vmatpush1.bf16.msra.mxu0 %v3454_v48  ;;  %v3522_v48 = vld [vmem:[%s4637_s11 + $0x27c] ss:$44 sps:$4 sm:$0xff]  }
 0x703   :  { %2494 = vmatpush1.bf16.msra.mxu1 %v3457_v49  ;;  %2454 = vmatprep.subr.bf16.mxu0 %v3462_v50  ;;  %v3525_v49 = vld [vmem:[%s4637_s11 + $0x284] ss:$44 sps:$4 sm:$0xff]  }
 0x704   :  { %2495 = vmatprep.subr.bf16.mxu1 %v3465_v51  ;;  %v3520_v50 = vld [vmem:[%s4637_s11 + $0x278] ss:$44 sps:$4 sm:$0xff]   ;;  %v3523_v51 = vld [vmem:[%s4637_s11 + $0x280] ss:$44 sps:$4 sm:$0xff]  }
 0x706   :  { %2455 = vmatpush1.bf16.msra.mxu0 %v3460_v52  ;;  %v3528_v52 = vld [vmem:[%s4637_s11 + $0x24] ss:$44 sps:$4 sm:$0xff]  }
 0x707   :  { %2496 = vmatpush1.bf16.msra.mxu1 %v3463_v53  ;;  %2456 = vmatprep.subr.bf16.mxu0 %v3468_v54  ;;  %v3526_v53 = vld [vmem:[%s4637_s11 + $0x20] ss:$44 sps:$4 sm:$0xff]   ;;  %v3529_v54 = vld [vmem:[%s4637_s11 + $0x28] ss:$44 sps:$4 sm:$0xff]  }
 0x708   :  { %2497 = vmatprep.subr.bf16.mxu1 %v3471_v55  ;;  %v3532_v55 = vld [vmem:[%s4637_s11 + $0x7c] ss:$44 sps:$4 sm:$0xff]  }
 0x70a   :  { %2457 = vmatpush1.bf16.msra.mxu0 %v3466_v56  ;;  %v3530_v56 = vld [vmem:[%s4637_s11 + $0x78] ss:$44 sps:$4 sm:$0xff]  }
 0x70b   :  { %2498 = vmatpush1.bf16.msra.mxu1 %v3469_v57  ;;  %2458 = vmatprep.subr.bf16.mxu0 %v3474_v58  ;;  %v3533_v57 = vld [vmem:[%s4637_s11 + $0x80] ss:$44 sps:$4 sm:$0xff]  }
 0x70c   :  { %2499 = vmatprep.subr.bf16.mxu1 %v3477_v59  ;;  %v3536_v58 = vld [vmem:[%s4637_s11 + $0xd4] ss:$44 sps:$4 sm:$0xff]   ;;  %v3534_v59 = vld [vmem:[%s4637_s11 + $0xd0] ss:$44 sps:$4 sm:$0xff]  }
 0x70e   :  { %2459 = vmatpush1.bf16.msra.mxu0 %v3472_v60  ;;  %v3537_v60 = vld [vmem:[%s4637_s11 + $0xd8] ss:$44 sps:$4 sm:$0xff]  }
 0x70f   :  { %2500 = vmatpush1.bf16.msra.mxu1 %v3475_v61  ;;  %2526 = vmatprep.subr.bf16.mxu0 %v3480_v62  ;;  %v3538_v61 = vld [vmem:[%s4637_s11 + $0x128] ss:$44 sps:$4 sm:$0xff]   ;;  %v3541_v62 = vld [vmem:[%s4637_s11 + $0x130] ss:$44 sps:$4 sm:$0xff]  }
 0x710   :  { %2567 = vmatprep.subr.bf16.mxu1 %v3483_v63  ;;  %v3544_v63 = vld [vmem:[%s4637_s11 + $0x184] ss:$44 sps:$4 sm:$0xff]  }
 0x7c4   :  { %v3122_v2 = vpop.f32.mrb[20].mxu0 }
 0x7c5   :  { %v3144_v3 = vpop.f32.mrb[16].mxu1  ;;  %v3123_v5 = vpop.f32.mrb[21].mxu0 }
 0x7c6   :  { %v3124_v6 = vadd.f32 %v3123_v5, %v3122_v2  ;;  %v3145_v7 = vpop.f32.mrb[17].mxu1  ;;  %v3125_v8 = vpop.f32.mrb[22].mxu0  ;;  %v3542_v2 = vld [vmem:[%s4637_s11 + $0x180] ss:$44 sps:$4 sm:$0xff]   ;;  %v3546_v5 = vld [vmem:[%s4637_s11 + $0x1d8] ss:$44 sps:$4 sm:$0xff]  }
 0x7c7   :  { %v3146_v9 = vadd.f32 %v3145_v7, %v3144_v3  ;;  %v3147_v10 = vpop.f32.mrb[18].mxu1  ;;  %v3126_v11 = vpop.f32.mrb[23].mxu0  ;;  %v3545_v3 = vld [vmem:[%s4637_s11 + $0x188] ss:$44 sps:$4 sm:$0xff]   ;;  %v3550_v8 = vld [vmem:[%s4637_s11 + $0x230] ss:$44 sps:$4 sm:$0xff]  }
 0x7c8   :  { %v1794_v12 = vadd.f32 %v3124_v6, %v1566_v4  ;;  %v3148_v13 = vpop.f32.mrb[19].mxu1  ;;  %v3548_v4 = vld [vmem:[%s4637_s11 + $0x1dc] ss:$44 sps:$4 sm:$0xff]   ;;  %v3549_v6 = vld [vmem:[%s4637_s11 + $0x1e0] ss:$44 sps:$4 sm:$0xff]  }
 0x7c9   :  { %v3552_v7 = vld [vmem:[%s4637_s11 + $0x234] ss:$44 sps:$4 sm:$0xff]   ;;  %v3556_v10 = vld [vmem:[%s4637_s11 + $0x28c] ss:$44 sps:$4 sm:$0xff]  }
 0x7ca   :  { %v1834_v14 = vadd.f32 %v3146_v9, %v1794_v12  ;;  %v3553_v9 = vld [vmem:[%s4637_s11 + $0x238] ss:$44 sps:$4 sm:$0xff]   ;;  %v3554_v11 = vld [vmem:[%s4637_s11 + $0x288] ss:$44 sps:$4 sm:$0xff]   ;;  %v3557_v12 = vld [vmem:[%s4637_s11 + $0x290] ss:$44 sps:$4 sm:$0xff]  }
 0x7cb   :  { %v1937_v13 = vld [vmem:[%s4638_s12] sm:$0xff] }
 0x7cc   :  { %v1839_v15 = vadd.f32 %v1834_v14, %v3923_v23  ;;  %v3484_v23 = vld [vmem:[%s4637_s11 + $0x68] ss:$44 sps:$4 sm:$0xff]   ;;  %v1944_v14 = vrot.slane %v1937_v13, %v3878_v41 }
 0x7ce   :  { %v4413_v20 = vpack.c.bf16 %v1839_v15, %v1839_v15  ;;  %v1952_v15 = vrot.slane %v1937_v13, %v4286_v16 }
 0x7d0   :  { %2477 = vmatmul.mubr.bf16.vlgmr.msra.gmra.mrb[24].mxu0 %v4413_v20  ;;  %2518 = vmatmul.mubr.bf16.vlgmr.msra.gmra.mrb[20].mxu1 %v4413_v20 }
 0x7d1   :  { %2527 = vmatpush1.bf16.msra.mxu0 %v3478_v17  ;;  %2568 = vmatpush1.bf16.msra.mxu1 %v3481_v19  ;;  %v1948_v17 = vrot.slane %v1937_v13, %v3884_v44  ;;  %v1956_v19 = vrot.slane %v1937_v13, %v4292_v18 }
 0x7d2   :  { %2528 = vmatprep.subr.bf16.mxu0 %v3486_v21  ;;  %2569 = vmatprep.subr.bf16.mxu1 %v3489_v22 }
 0x7d3   :  { %2558 = vmatprep.mubr.bf16.mxu0 %v3626_v1  ;;  %2599 = vmatprep.mubr.bf16.mxu1 %v3626_v1 }
 0x7d5   :  { %2529 = vmatpush1.bf16.msra.mxu0 %v3484_v23  ;;  %2570 = vmatpush1.bf16.msra.mxu1 %v3487_v24 }
 0x7d6   :  { %2530 = vmatprep.subr.bf16.mxu0 %v3492_v25  ;;  %2571 = vmatprep.subr.bf16.mxu1 %v3495_v26 }
 0x7d9   :  { %2531 = vmatpush1.bf16.msra.mxu0 %v3490_v27  ;;  %2572 = vmatpush1.bf16.msra.mxu1 %v3493_v28 }
 0x7da   :  { %2532 = vmatprep.subr.bf16.mxu0 %v3498_v29  ;;  %2573 = vmatprep.subr.bf16.mxu1 %v3501_v30 }
 0x7dd   :  { %2533 = vmatpush1.bf16.msra.mxu0 %v3496_v31  ;;  %2574 = vmatpush1.bf16.msra.mxu1 %v3499_v32 }
 0x7de   :  { %2534 = vmatprep.subr.bf16.mxu0 %v3504_v33  ;;  %2575 = vmatprep.subr.bf16.mxu1 %v3507_v34 }
 0x7e1   :  { %2535 = vmatpush1.bf16.msra.mxu0 %v3502_v35  ;;  %2576 = vmatpush1.bf16.msra.mxu1 %v3505_v36 }
 0x7e2   :  { %2536 = vmatprep.subr.bf16.mxu0 %v3510_v37  ;;  %2577 = vmatprep.subr.bf16.mxu1 %v3513_v38 }
 0x7e5   :  { %2537 = vmatpush1.bf16.msra.mxu0 %v3508_v39  ;;  %2578 = vmatpush1.bf16.msra.mxu1 %v3511_v42 }
 0x7e6   :  { %2538 = vmatprep.subr.bf16.mxu0 %v3516_v43  ;;  %2579 = vmatprep.subr.bf16.mxu1 %v3519_v45 }
 0x7e9   :  { %2539 = vmatpush1.bf16.msra.mxu0 %v3514_v46  ;;  %2580 = vmatpush1.bf16.msra.mxu1 %v3517_v47 }
 0x7ea   :  { %2540 = vmatprep.subr.bf16.mxu0 %v3522_v48  ;;  %2581 = vmatprep.subr.bf16.mxu1 %v3525_v49  ;;  %v1959_v49 = vsub.s32 4, %v3875_v40 }
 0x7ed   :  { %2541 = vmatpush1.bf16.msra.mxu0 %v3520_v50  ;;  %2582 = vmatpush1.bf16.msra.mxu1 %v3523_v51  ;;  %v1967_v50 = vsub.s32 6, %v3875_v40  ;;  %v1963_v51 = vsub.s32 5, %v3875_v40 }
 0x7ee   :  { %2608 = vmatprep.subr.bf16.mxu0 %v3528_v52  ;;  %3193 = vmatprep.subr.bf16.mxu1 %v3624_v0  ;;  %v1971_v52 = vsub.s32 7, %v3875_v40 }
 0x7f0   :  { %2559 = vmatmul.mubr.bf16.vlgmr.msra.gmra.mrb[28].mxu0 %v4413_v20  ;;  %2600 = vmatmul.mubr.bf16.vlgmr.msra.gmra.mrb[24].mxu1 %v4413_v20 }
 0x7f1   :  { %2609 = vmatpush1.bf16.msra.mxu0 %v3526_v53  ;;  %3194 = vmatpush3.bf16.msra.mxu1 %v3529_v54  ;;  %v1960_v53 = vrot.slane %v1937_v13, %v1959_v49  ;;  %v1968_v54 = vrot.slane %v1937_v13, %v1967_v50 }
 0x7f2   :  { %2610 = vmatprep.subr.bf16.mxu0 %v3532_v55  ;;  %3195 = vmatprep.subr.bf16.mxu1 %v3624_v0 }
 0x7f3   :  { %2640 = vmatprep.mubr.bf16.mxu0 %v3626_v1  ;;  %3209 = vmatprep.mubr.msk.bf16.mxu1 %vm3625_vm0, %v3624_v0  ;;  %v3540_v1 = vld [vmem:[%s4637_s11 + $0x12c] ss:$44 sps:$4 sm:$0xff]  }
 0x7f5   :  { %2611 = vmatpush1.bf16.msra.mxu0 %v3530_v56  ;;  %3196 = vmatpush3.bf16.msra.mxu1 %v3533_v57  ;;  %v1964_v56 = vrot.slane %v1937_v13, %v1963_v51  ;;  %v1972_v57 = vrot.slane %v1937_v13, %v1971_v52 }
 0x7f6   :  { %2612 = vmatprep.subr.bf16.mxu0 %v3536_v58  ;;  %3197 = vmatprep.subr.bf16.mxu1 %v3624_v0 }
 0x7f9   :  { %2613 = vmatpush1.bf16.msra.mxu0 %v3534_v59  ;;  %3198 = vmatpush3.bf16.msra.mxu1 %v3537_v60 }
 0x7fa   :  { %2614 = vmatprep.subr.bf16.mxu0 %v3540_v1  ;;  %3199 = vmatprep.subr.bf16.mxu1 %v3624_v0 }
 0x7fd   :  { %2615 = vmatpush1.bf16.msra.mxu0 %v3538_v61  ;;  %3200 = vmatpush3.bf16.msra.mxu1 %v3541_v62 }
 0x7fe   :  { %2616 = vmatprep.subr.bf16.mxu0 %v3544_v63  ;;  %3201 = vmatprep.subr.bf16.mxu1 %v3624_v0 }
 0x801   :  { %2617 = vmatpush1.bf16.msra.mxu0 %v3542_v2  ;;  %3202 = vmatpush3.bf16.msra.mxu1 %v3545_v3 }
 0x802   :  { %2618 = vmatprep.subr.bf16.mxu0 %v3548_v4  ;;  %3203 = vmatprep.subr.bf16.mxu1 %v3624_v0 }
 0x805   :  { %2619 = vmatpush1.bf16.msra.mxu0 %v3546_v5  ;;  %3204 = vmatpush3.bf16.msra.mxu1 %v3549_v6 }
 0x806   :  { %2620 = vmatprep.subr.bf16.mxu0 %v3552_v7  ;;  %3205 = vmatprep.subr.bf16.mxu1 %v3624_v0 }
 0x809   :  { %2621 = vmatpush1.bf16.msra.mxu0 %v3550_v8  ;;  %3206 = vmatpush3.bf16.msra.mxu1 %v3553_v9 }
 0x80a   :  { %2622 = vmatprep.subr.bf16.mxu0 %v3556_v10  ;;  %3207 = vmatprep.subr.bf16.mxu1 %v3624_v0 }
 0x80d   :  { %2623 = vmatpush1.bf16.msra.mxu0 %v3554_v11  ;;  %3208 = vmatpush3.bf16.msra.mxu1 %v3557_v12 }
 0x810   :  { %2641 = vmatmul.mubr.bf16.vlgmr.msra.gmra.mrb[32].mxu0 %v4413_v20  ;;  %3210 = vmatmul.mubr.bf16.vlgmr.msra.gmra.mrb[28].mxu1 %v4413_v20 }
 0x8a3   :  { %v2478_v21 = vpop.f32.mrb[24].mxu0  ;;  %v2519_v0 = vpop.f32.mrb[20].mxu1 }
 0x8a4   :  { %v2479_v22 = vadd.f32 %v2478_v21, %v1944_v14  ;;  %v2520_v23 = vadd.f32 %v2519_v0, %v1952_v15  ;;  %v2480_v24 = vpop.f32.mrb[25].mxu0  ;;  %v2521_v25 = vpop.f32.mrb[21].mxu1 }
 0x8a5   :  { %v2481_v26 = vadd.f32 %v2480_v24, %v1948_v17  ;;  %v2522_v20 = vadd.f32 %v2521_v25, %v1956_v19  ;;  %v2482_v27 = vpop.f32.mrb[26].mxu0  ;;  %v2523_v28 = vpop.f32.mrb[22].mxu1 }
 0x8a6   :  { %v2689_v29 = vsub.f32 0.0, %v2479_v22  ;;  %v2691_v30 = vsub.f32 0.0, %v2520_v23  ;;  %v2483_v31 = vpop.f32.mrb[27].mxu0  ;;  %v2524_v32 = vpop.f32.mrb[23].mxu1  ;;  %v1938_v28 = vld [vmem:[%s4638_s12 + $0x8] sm:$0x7] }
 0x8a7   :  { %v2690_v33 = vsub.f32 0.0, %v2481_v26  ;;  %v2692_v34 = vsub.f32 0.0, %v2522_v20  ;;  %v1980_v32 = vrot.slane %v1938_v28, %v3884_v44 }
 0x8a8   :  { %v2700_v35 = vmul.f32 1.442695, %v2689_v29  ;;  %v2704_v36 = vmul.f32 1.442695, %v2691_v30  ;;  %v1976_v29 = vrot.slane %v1938_v28, %v3878_v41  ;;  %v1984_v30 = vrot.slane %v1938_v28, %v4286_v16 }
 0x8a9   :  { %v2702_v37 = vmul.f32 1.442695, %v2690_v33  ;;  %v2706_v18 = vmul.f32 1.442695, %v2692_v34 }
 0x8aa   :  { %3580 = vpow2.f32 %v2700_v35 }
 0x8ab   :  { %3582 = vpow2.f32 %v2704_v36 }
 0x8ac   :  { %3584 = vpow2.f32 %v2702_v37 }
 0x8ad   :  { %3586 = vpow2.f32 %v2706_v18 }
 0x8b4   :  { %v3581_v38 = vpop.eup %3580 }
 0x8b5   :  { %v3583_v39 = vpop.eup %3582  ;;  %v2722_v42 = vadd.f32 1.0, %v3581_v38 }
 0x8b6   :  { %v3585_v43 = vpop.eup %3584  ;;  %v2724_v45 = vadd.f32 1.0, %v3583_v39 }
 0x8b7   :  { %v3587_v46 = vpop.eup %3586  ;;  %3588 = vrcp.f32 %v2722_v42  ;;  %v2723_v47 = vadd.f32 1.0, %v3585_v43 }
 0x8b8   :  { %3590 = vrcp.f32 %v2724_v45  ;;  %v2725_v48 = vadd.f32 1.0, %v3587_v46 }
 0x8b9   :  { %3592 = vrcp.f32 %v2723_v47 }
 0x8ba   :  { %3594 = vrcp.f32 %v2725_v48 }
 0x8c1   :  { %v3589_v55 = vpop.eup %3588 }
 0x8c2   :  { %v3591_v58 = vpop.eup %3590 }
 0x8c3   :  { %v3593_v59 = vpop.eup %3592  ;;  %v2560_v60 = vpop.f32.mrb[28].mxu0 }
 0x8c4   :  { %v2601_v1 = vpop.f32.mrb[24].mxu1  ;;  %v3595_v61 = vpop.eup %3594  ;;  %v3064_v62 = vpack.c.bf16 %v3593_v59, %v3589_v55  ;;  %v2561_v63 = vadd.f32 %v2560_v60, %v1960_v53 }
 0x8c5   :  { %v2602_v2 = vadd.f32 %v2601_v1, %v1968_v54  ;;  %v2562_v3 = vpop.f32.mrb[29].mxu0  ;;  %v2603_v4 = vpop.f32.mrb[25].mxu1  ;;  %v3065_v5 = vpack.c.bf16 %v3595_v61, %v3591_v58 }
 0x8c6   :  { %v2563_v6 = vadd.f32 %v2562_v3, %v1964_v56  ;;  %v2604_v7 = vadd.f32 %v2603_v4, %v1972_v57  ;;  %v2564_v8 = vpop.f32.mrb[30].mxu0  ;;  %v2605_v40 = vpop.f32.mrb[26].mxu1  ;;  %2789 = vst [vmem:[%s4639_s14] sm:$0xff] %v3064_v62  ;;  %v2693_v9 = vsub.f32 0.0, %v2561_v63 }
 0x8c7   :  { %v2695_v10 = vsub.f32 0.0, %v2602_v2  ;;  %v2565_v11 = vpop.f32.mrb[31].mxu0  ;;  %v2606_v12 = vpop.f32.mrb[27].mxu1  ;;  %2790 = vst [vmem:[%s4639_s14 + $0x8] sm:$0xff] %v3065_v5 }
 0x8c8   :  { %v2694_v13 = vsub.f32 0.0, %v2563_v6  ;;  %v2696_v14 = vsub.f32 0.0, %v2604_v7  ;;  %v2708_v15 = vmul.f32 1.442695, %v2693_v9 }
 0x8c9   :  { %v2712_v17 = vmul.f32 1.442695, %v2695_v10 }
 0x8ca   :  { %v2710_v19 = vmul.f32 1.442695, %v2694_v13  ;;  %v2714_v21 = vmul.f32 1.442695, %v2696_v14  ;;  %3596 = vpow2.f32 %v2708_v15 }
 0x8cb   :  { %3598 = vpow2.f32 %v2712_v17 }
 0x8cc   :  { %3600 = vpow2.f32 %v2710_v19 }
 0x8cd   :  { %3602 = vpow2.f32 %v2714_v21 }
 0x8d4   :  { %v3597_v0 = vpop.eup %3596 }
 0x8d5   :  { %v3599_v22 = vpop.eup %3598  ;;  %v2726_v23 = vadd.f32 1.0, %v3597_v0 }
 0x8d6   :  { %v3601_v24 = vpop.eup %3600  ;;  %v2728_v25 = vadd.f32 1.0, %v3599_v22 }
 0x8d7   :  { %v3603_v26 = vpop.eup %3602  ;;  %3604 = vrcp.f32 %v2726_v23  ;;  %v2727_v20 = vadd.f32 1.0, %v3601_v24 }
 0x8d8   :  { %3606 = vrcp.f32 %v2728_v25  ;;  %v2729_v27 = vadd.f32 1.0, %v3603_v26 }
 0x8d9   :  { %3608 = vrcp.f32 %v2727_v20 }
 0x8da   :  { %3610 = vrcp.f32 %v2729_v27 }
 0x8e1   :  { %v3605_v31 = vpop.eup %3604 }
 0x8e2   :  { %v3607_v33 = vpop.eup %3606 }
 0x8e3   :  { %v3609_v34 = vpop.eup %3608  ;;  %v2642_v35 = vpop.f32.mrb[32].mxu0 }
 0x8e4   :  { %v2683_v36 = vpop.f32.mrb[28].mxu1  ;;  %v3611_v37 = vpop.eup %3610  ;;  %v3066_v18 = vpack.c.bf16 %v3609_v34, %v3605_v31  ;;  %v2643_v38 = vadd.f32 %v2642_v35, %v1976_v29 }
 0x8e5   :  { %v2684_v39 = vadd.f32 %v2683_v36, %v1984_v30  ;;  %v2644_v42 = vpop.f32.mrb[33].mxu0  ;;  %v3211_v43 = vpop.f32.mrb[29].mxu1  ;;  %v3067_v45 = vpack.c.bf16 %v3611_v37, %v3607_v33 }
 0x8e6   :  { %v2645_v46 = vadd.f32 %v2644_v42, %v1980_v32  ;;  %v2646_v47 = vpop.f32.mrb[34].mxu0  ;;  %v2686_v48 = vpop.f32.mrb[30].mxu1  ;;  %2791 = vst [vmem:[%s4639_s14 + $0x10] sm:$0xff] %v3066_v18  ;;  %v2697_v41 = vsub.f32 0.0, %v2643_v38 }
 0x8e7   :  { %v2699_v44 = vsub.f32 0.0, %v2684_v39  ;;  %v2647_v16 = vpop.f32.mrb[35].mxu0  ;;  %v3212_v49 = vpop.f32.mrb[31].mxu1  ;;  %2792 = vst [vmem:[%s4639_s14 + $0x18] sm:$0xff] %v3067_v45 }
 0x8e8   :  { %v2698_v50 = vsub.f32 0.0, %v2645_v46  ;;  %v2716_v51 = vmul.f32 1.442695, %v2697_v41 }
 0x8e9   :  { %v2720_v52 = vmul.f32 1.442695, %v2699_v44 }
 0x8ea   :  { %v2718_v53 = vmul.f32 1.442695, %v2698_v50  ;;  %3612 = vpow2.f32 %v2716_v51 }
 0x8eb   :  { %3614 = vpow2.f32 %v2720_v52 }
 0x8ec   :  { %3616 = vpow2.f32 %v2718_v53 }
 0x8f4   :  { %v3613_v54 = vpop.eup %3612 }
 0x8f5   :  { %v3615_v55 = vpop.eup %3614  ;;  %v2730_v56 = vadd.f32 1.0, %v3613_v54 }
 0x8f6   :  { %v3617_v57 = vpop.eup %3616  ;;  %v2732_v58 = vadd.f32 1.0, %v3615_v55 }
 0x8f7   :  { %3618 = vrcp.f32 %v2730_v56  ;;  %v2731_v59 = vadd.f32 1.0, %v3617_v57 }
 0x8f8   :  { %3620 = vrcp.f32 %v2732_v58 }
 0x8f9   :  { %3622 = vrcp.f32 %v2731_v59 }
 0x901   :  { %v3619_v60 = vpop.eup %3618 }
 0x902   :  { %v3621_v1 = vpop.eup %3620 }
 0x903   :  { %v3623_v61 = vpop.eup %3622  ;;  %v3069_v62 = vpack.c.bf16 %v3621_v1, %v3621_v1 }
 0x904   :  { %v3068_v63 = vpack.c.bf16 %v3623_v61, %v3619_v60 }
 0x905   :  { %2795 = vst.msk [vmem:[%s4639_s14 + $0x28] sm:$0xf] %vm2794_vm5, %v3069_v62 }
 0x906   :  { %2793 = vst [vmem:[%s4639_s14 + $0x20] sm:$0xff] %v3068_v63 }

</bundles_post_ra>
